<compile_context>
chip_gen: v5e
topology: v5e:2x2
jax: 0.10.0
libtpu: 0.0.40
codegen_flags: <defaults>
</compile_context>

<pallas_src>
import functools

import numpy as np
import jax
import jax.numpy as jnp
from jax import lax
from jax.experimental import pallas as pl
from jax.experimental.pallas import tpu as pltpu

NEG_SLOPE = 0.01   # F.leaky_relu default negative slope
BN_EPS = 1e-5      # nn.BatchNorm2d default eps


# --------------------------------------------------------------------------- #
# Small in-kernel helpers
# --------------------------------------------------------------------------- #
def _tile_cols(v, reps):
    """(1, C) -> (1, reps*C): repeat a per-channel row across the width blocks."""
    if reps == 1:
        return v
    return jnp.concatenate([v] * reps, axis=1)


def _fold_cols(v, wout, cout):
    """(1, wout*C) -> (1, C): sum the wout per-width column blocks."""
    out = v[:, 0:cout]
    for q in range(1, wout):
        out = out + v[:, q * cout:(q + 1) * cout]
    return out


def _batchnorm(y, gamma, beta, wout, cout, count):
    """Training-mode BatchNorm2d with single-pass batch statistics (f32)."""
    s1 = jnp.sum(y, axis=0, keepdims=True)
    s2 = jnp.sum(y * y, axis=0, keepdims=True)
    mean = _fold_cols(s1, wout, cout) / count
    var = jnp.maximum(_fold_cols(s2, wout, cout) / count - mean * mean, 0.0)
    scale = gamma * lax.rsqrt(var + BN_EPS)
    shift = beta - mean * scale
    return y * _tile_cols(scale, wout) + _tile_cols(shift, wout)


def _gather_rows(a, n, he, hout, off):
    """Stride-2 row gather = static contiguous per-sample slices of a
    row-parity-split activation block (no selection matmul, no strided access)."""
    parts = [a[b * he + off: b * he + off + hout, :] for b in range(n)]
    return parts[0] if n == 1 else jnp.concatenate(parts, axis=0)


def _conv_block(a_even, a_odd, w_ref, n, hin, win):
    """One 4x4 / stride-2 / pad-1 conv as a SINGLE fused bf16 MXU matmul.

    a_even, a_odd : (n*(hin//2+1), 2*(win//2+1)*cin) bf16 — padded activation,
                    rows split by padded-row parity, cols = (w-parity, j, cin).
    w_ref         : (4 * 2*(win//2+1)*cin, (win//2)*cout) bf16 packed weight
                    (kh stacked into K; width taps + output perm folded in).
    returns (n*(hin//2), (win//2)*cout) f32, output columns already permuted
    into the next layer's width-phase order.
    """
    he = hin // 2 + 1
    hout = hin // 2
    # kh -> (row parity, row offset): 0->(even,0), 1->(odd,0), 2->(even,1), 3->(odd,1)
    g = jnp.concatenate(
        [_gather_rows(a_even, n, he, hout, 0),
         _gather_rows(a_odd, n, he, hout, 0),
         _gather_rows(a_even, n, he, hout, 1),
         _gather_rows(a_odd, n, he, hout, 1)],
        axis=1)                                           # (n*hout, 4*K) bf16
    return jnp.dot(g, w_ref[...], preferred_element_type=jnp.float32)


def _next_layer_blocks(y, n, hout, wout, cout):
    """Re-layout this layer's activation (f32, rows (b, oh), cols already in
    the next layer's width-phase order) into the next layer's row-parity-split,
    zero-padded bf16 input blocks.  Pure static slicing / concatenation on
    register values — no VMEM round trip, no masked stores."""
    c_tot = wout * cout
    yb = y.astype(jnp.bfloat16)
    zrow = jnp.zeros((1, c_tot), jnp.bfloat16)
    ev_parts, od_parts = [], []
    for b in range(n):
        even_oh = [yb[b * hout + oh: b * hout + oh + 1, :] for oh in range(0, hout, 2)]
        odd_oh = [yb[b * hout + oh: b * hout + oh + 1, :] for oh in range(1, hout, 2)]
        ev_parts.extend([zrow] + odd_oh)      # padded even rows p' = 0, 2, ..., hout
        od_parts.extend(even_oh + [zrow])     # padded odd rows  p' = 1, 3, ..., hout+1
    a_even = jnp.concatenate(ev_parts, axis=0)
    a_odd = jnp.concatenate(od_parts, axis=0)
    # One cout-wide zero block on each side completes the next layer's
    # (w-parity, j, c) column layout (width padding).
    zcol = jnp.zeros((n * (hout // 2 + 1), cout), jnp.bfloat16)
    a_even = jnp.concatenate([zcol, a_even, zcol], axis=1)
    a_odd = jnp.concatenate([zcol, a_odd, zcol], axis=1)
    return a_even, a_odd


# --------------------------------------------------------------------------- #
# The fused kernel: conv0+lrelu, 3x (conv+BN+lrelu), sigmoid, per-sample mean
# --------------------------------------------------------------------------- #
def _discriminator_kernel(x0e_ref, x0o_ref, w0_ref, b0_ref,
                          w1_ref, g1_ref, bt1_ref,
                          w2_ref, g2_ref, bt2_ref,
                          w3_ref, g3_ref, bt3_ref,
                          out_ref, *, n, layer_dims):
    w_refs = (w0_ref, w1_ref, w2_ref, w3_ref)
    bn_refs = (None, (g1_ref, bt1_ref), (g2_ref, bt2_ref), (g3_ref, bt3_ref))

    a_even = x0e_ref[...]          # bf16, rows = (b, even padded h)
    a_odd = x0o_ref[...]           # bf16, rows = (b, odd padded h)

    y = None
    for li, (hin, win, _cin, cout) in enumerate(layer_dims):
        hout, wout = hin // 2, win // 2
        y = _conv_block(a_even, a_odd, w_refs[li], n, hin, win)
        if li == 0:
            # Layer 0: conv bias + LeakyReLU (bn0 is unused in the forward pass).
            y = y + _tile_cols(b0_ref[...], wout)
        else:
            # The conv bias is exactly cancelled by the batch-mean subtraction
            # of the training-mode BatchNorm that follows, so it is skipped.
            g_ref, bt_ref = bn_refs[li]
            y = _batchnorm(y, g_ref[...], bt_ref[...], wout, cout,
                           float(n * hout * wout))
        y = jnp.where(y >= 0.0, y, NEG_SLOPE * y)         # LeakyReLU(0.01)
        if li + 1 < len(layer_dims):
            a_even, a_odd = _next_layer_blocks(y, n, hout, wout, cout)

    # Epilogue: sigmoid via one EUP tanh, then a single per-sample mean.
    sig = 0.5 * (jnp.tanh(0.5 * y) + 1.0)                 # (n*hout3, wout3*cout3)
    hout3 = layer_dims[-1][0] // 2
    if hout3 == 1:
        out_ref[...] = jnp.mean(sig, axis=1, keepdims=True)
    else:  # general spatial case (not exercised by the 16x16 demo)
        parts = [jnp.mean(jnp.mean(sig[b * hout3:(b + 1) * hout3, :],
                                   axis=1, keepdims=True), axis=0, keepdims=True)
                 for b in range(n)]
        out_ref[...] = parts[0] if n == 1 else jnp.concatenate(parts, axis=0)


# --------------------------------------------------------------------------- #
# Offline parameter packing and input layout plumbing (wrapper side)
# --------------------------------------------------------------------------- #
def _q_perm(wout):
    """Maps output width position ow -> column block q, so that the conv output
    comes out ordered exactly like the next layer's (w-parity, j') layout."""
    q = np.zeros((wout,), np.int64)
    for ow in range(wout):
        wp = ow + 1                       # padded width coord in the next layer
        if wp % 2 == 0:
            q[ow] = wp // 2 - 1           # even-phase block, j' in [1, wout//2]
        else:
            q[ow] = wout // 2 + wp // 2   # odd-phase block,  j' in [0, wout//2)
    return q


def _pack_conv_weight(w_hwio, win):
    """(4,4,cin,cout) HWIO conv weight -> (4*2*(win//2+1)*cin, (win//2)*cout)
    bf16 block matrix: kh stacked into K, width taps + stride-2 width phases +
    output permutation folded in."""
    w_np = np.asarray(jax.device_get(w_hwio), np.float32)
    cin, cout = w_np.shape[2], w_np.shape[3]
    wout, whp = win // 2, win // 2 + 1
    q = _q_perm(wout)
    kw_cols = 2 * whp * cin
    packed = np.zeros((4 * kw_cols, wout * cout), np.float32)
    for kh in range(4):
        for kw in range(4):
            pw, dj = kw % 2, kw // 2
            for ow in range(wout):
                j = ow + dj
                r0 = kh * kw_cols + (pw * whp + j) * cin
                c0 = int(q[ow]) * cout
                packed[r0:r0 + cin, c0:c0 + cout] += w_np[kh, kw]
    return jnp.asarray(packed, jnp.bfloat16)


def _pack_input(x_nhwc):
    """NHWC -> two bf16 row-parity-split, width-phase-split 2D blocks, each
    (n*(H//2+1), 2*(W//2+1)*C), rows = (b, h_idx), cols = (w-parity, j, c)."""
    n, hin, win, c = x_nhwc.shape
    he, whp = hin // 2 + 1, win // 2 + 1
    xp = jnp.pad(x_nhwc, ((0, 0), (1, 1), (1, 1), (0, 0)))
    xp = xp.reshape(n, he, 2, whp, 2, c)            # padded h = 2*i+ph, w = 2*j+pw
    xp = jnp.transpose(xp, (2, 0, 1, 4, 3, 5))      # (ph, n, i, pw, j, c)
    xp = xp.reshape(2, n * he, 2 * whp * c).astype(jnp.bfloat16)
    return xp[0], xp[1]


def init_params(key, in_channels=3, mid_ch=8):
    """Deterministic synthetic parameters (PyTorch-default-style init)."""
    chans = [in_channels, mid_ch, mid_ch * 2, mid_ch * 4, mid_ch * 8]
    params = {}
    keys = jax.random.split(key, 8)
    for i in range(4):
        cin, cout = chans[i], chans[i + 1]
        bound = 1.0 / float(np.sqrt(cin * 16))
        params[f'w{i}'] = jax.random.uniform(keys[2 * i], (4, 4, cin, cout),
                                             jnp.float32, -bound, bound)
        params[f'b{i}'] = jax.random.uniform(keys[2 * i + 1], (cout,),
                                             jnp.float32, -bound, bound)
        if i > 0:  # bn1..bn3 are used in forward (bn0 is unused, as in the module)
            params[f'g{i}'] = jnp.ones((cout,), jnp.float32)
            params[f'beta{i}'] = jnp.zeros((cout,), jnp.float32)
    return params


def pack_params(params, layer_dims):
    packed = {}
    for i, (_hin, win, _cin, _cout) in enumerate(layer_dims):
        packed[f'w{i}'] = _pack_conv_weight(params[f'w{i}'], win)
        if i == 0:
            packed['b0'] = params['b0'].reshape(1, -1).astype(jnp.float32)
        else:
            packed[f'g{i}'] = params[f'g{i}'].reshape(1, -1).astype(jnp.float32)
            packed[f'beta{i}'] = params[f'beta{i}'].reshape(1, -1).astype(jnp.float32)
    return packed


@functools.partial(jax.jit, static_argnames=('w', 'h', 'layer_dims'))
def discriminator_2d_forward(x, packed, *, w, h, layer_dims):
    """Equivalent of discriminator_2d.forward (training-mode BatchNorm)."""
    for (hin, win, _, _) in layer_dims:
        assert hin % 2 == 0 and win % 2 == 0, "spatial dims must be divisible by 16"

    x = x.reshape(-1, 3, w, h)                       # x.view(-1, 3, w, h)
    n = x.shape[0]
    x_nhwc = jnp.transpose(x, (0, 2, 3, 1)).astype(jnp.float32)
    x0e, x0o = _pack_input(x_nhwc)

    kernel = functools.partial(_discriminator_kernel, n=n, layer_dims=layer_dims)
    vmem = pl.BlockSpec(memory_space=pltpu.MemorySpace.VMEM)
    out = pl.pallas_call(
        kernel,
        out_shape=jax.ShapeDtypeStruct((n, 1), jnp.float32),
        in_specs=[vmem] * 13,
        out_specs=vmem,
    )(x0e, x0o,
      packed['w0'], packed['b0'],
      packed['w1'], packed['g1'], packed['beta1'],
      packed['w2'], packed['g2'], packed['beta2'],
      packed['w3'], packed['g3'], packed['beta3'])
    return out[:, 0]


# --------------------------------------------------------------------------- #
# Pure-JAX reference (mirrors the kernel's bf16 matmul inputs / f32 accum)
# --------------------------------------------------------------------------- #
def reference_forward(x_nchw, params, w, h):
    x = jnp.transpose(x_nchw.reshape(-1, 3, w, h), (0, 2, 3, 1)).astype(jnp.float32)
    n = x.shape[0]

    def conv(v, wk, b):
        y = lax.conv_general_dilated(
            v.astype(jnp.bfloat16), wk.astype(jnp.bfloat16), (2, 2),
            ((1, 1), (1, 1)), dimension_numbers=('NHWC', 'HWIO', 'NHWC'),
            preferred_element_type=jnp.float32)
        return y + b.reshape(1, 1, 1, -1)

    def lrelu(v):
        return jnp.where(v >= 0.0, v, NEG_SLOPE * v)

    def bn(v, g, beta):
        mean = jnp.mean(v, axis=(0, 1, 2), keepdims=True)
        var = jnp.mean((v - mean) ** 2, axis=(0, 1, 2), keepdims=True)
        return ((v - mean) * lax.rsqrt(var + BN_EPS) * g.reshape(1, 1, 1, -1)
                + beta.reshape(1, 1, 1, -1))

    h0 = lrelu(conv(x, params['w0'], params['b0']))
    h1 = lrelu(bn(conv(h0, params['w1'], params['b1']), params['g1'], params['beta1']))
    h2 = lrelu(bn(conv(h1, params['w2'], params['b2']), params['g2'], params['beta2']))
    h3 = lrelu(bn(conv(h2, params['w3'], params['b3']), params['g3'], params['beta3']))
    h3 = jax.nn.sigmoid(h3)
    return jnp.mean(h3.reshape(n, -1), axis=1)


if __name__ == "__main__":
    W = H = 16
    MID_CH = 8          # module default is 64; kept small -> channels 8/16/32/64
    key = jax.random.PRNGKey(0)
    pkey, xkey = jax.random.split(key)

    params = init_params(pkey, in_channels=3, mid_ch=MID_CH)
    x = jax.random.normal(xkey, (2, 3, W, H), jnp.float32)       # NCHW, like PyTorch

    chans = [3, MID_CH, MID_CH * 2, MID_CH * 4, MID_CH * 8]
    layer_dims = tuple((W // (2 ** i), H // (2 ** i), chans[i], chans[i + 1])
                       for i in range(4))
    packed = pack_params(params, layer_dims)

    out = discriminator_2d_forward(x, packed, w=W, h=H, layer_dims=layer_dims)
    out = jax.block_until_ready(out)

    ref = reference_forward(x, params, W, H)
    assert out.shape == (2,), out.shape
    assert jnp.allclose(out, ref, rtol=2e-3, atol=2e-3), (out, ref)
    print("KERNEL_OK")
</pallas_src>

<mosaic_0001>
module attributes {stable_mosaic.version = 11 : i64} {
  func.func @_discriminator_kernel(%arg0: memref<18x54xbf16, #tpu.memory_space<vmem>>, %arg1: memref<18x54xbf16, #tpu.memory_space<vmem>>, %arg2: memref<216x64xbf16, #tpu.memory_space<vmem>>, %arg3: memref<1x8xf32, #tpu.memory_space<vmem>>, %arg4: memref<320x64xbf16, #tpu.memory_space<vmem>>, %arg5: memref<1x16xf32, #tpu.memory_space<vmem>>, %arg6: memref<1x16xf32, #tpu.memory_space<vmem>>, %arg7: memref<384x64xbf16, #tpu.memory_space<vmem>>, %arg8: memref<1x32xf32, #tpu.memory_space<vmem>>, %arg9: memref<1x32xf32, #tpu.memory_space<vmem>>, %arg10: memref<512x64xbf16, #tpu.memory_space<vmem>>, %arg11: memref<1x64xf32, #tpu.memory_space<vmem>>, %arg12: memref<1x64xf32, #tpu.memory_space<vmem>>, %arg13: memref<2x1xf32, #tpu.memory_space<vmem>>) attributes {dimension_semantics = [], scalar_prefetch = 0 : i64, scratch_operands = 0 : i64, tpu.core_type = #tpu.core_type<tc>} {
    %c0 = arith.constant 0 : index
    %c0_0 = arith.constant 0 : index
    %0 = vector.load %arg0[%c0, %c0_0] : memref<18x54xbf16, #tpu.memory_space<vmem>>, vector<18x54xbf16>
    %c0_1 = arith.constant 0 : index
    %c0_2 = arith.constant 0 : index
    %1 = vector.load %arg1[%c0_1, %c0_2] : memref<18x54xbf16, #tpu.memory_space<vmem>>, vector<18x54xbf16>
    %2 = vector.extract_strided_slice %0 {offsets = [0, 0], sizes = [8, 54], strides = [1, 1]} : vector<18x54xbf16> to vector<8x54xbf16>
    %3 = vector.extract_strided_slice %0 {offsets = [9, 0], sizes = [8, 54], strides = [1, 1]} : vector<18x54xbf16> to vector<8x54xbf16>
    %4 = tpu.concatenate %2, %3 in 0 : vector<8x54xbf16>, vector<8x54xbf16> -> vector<16x54xbf16>
    %5 = vector.extract_strided_slice %1 {offsets = [0, 0], sizes = [8, 54], strides = [1, 1]} : vector<18x54xbf16> to vector<8x54xbf16>
    %6 = vector.extract_strided_slice %1 {offsets = [9, 0], sizes = [8, 54], strides = [1, 1]} : vector<18x54xbf16> to vector<8x54xbf16>
    %7 = tpu.concatenate %5, %6 in 0 : vector<8x54xbf16>, vector<8x54xbf16> -> vector<16x54xbf16>
    %8 = vector.extract_strided_slice %0 {offsets = [1, 0], sizes = [8, 54], strides = [1, 1]} : vector<18x54xbf16> to vector<8x54xbf16>
    %9 = vector.extract_strided_slice %0 {offsets = [10, 0], sizes = [8, 54], strides = [1, 1]} : vector<18x54xbf16> to vector<8x54xbf16>
    %10 = tpu.concatenate %8, %9 in 0 : vector<8x54xbf16>, vector<8x54xbf16> -> vector<16x54xbf16>
    %11 = vector.extract_strided_slice %1 {offsets = [1, 0], sizes = [8, 54], strides = [1, 1]} : vector<18x54xbf16> to vector<8x54xbf16>
    %12 = vector.extract_strided_slice %1 {offsets = [10, 0], sizes = [8, 54], strides = [1, 1]} : vector<18x54xbf16> to vector<8x54xbf16>
    %13 = tpu.concatenate %11, %12 in 0 : vector<8x54xbf16>, vector<8x54xbf16> -> vector<16x54xbf16>
    %14 = tpu.concatenate %4, %7, %10, %13 in 1 : vector<16x54xbf16>, vector<16x54xbf16>, vector<16x54xbf16>, vector<16x54xbf16> -> vector<16x216xbf16>
    %c0_3 = arith.constant 0 : index
    %c0_4 = arith.constant 0 : index
    %15 = vector.load %arg2[%c0_3, %c0_4] : memref<216x64xbf16, #tpu.memory_space<vmem>>, vector<216x64xbf16>
    %cst = arith.constant dense<0.000000e+00> : vector<16x64xf32>
    %16 = tpu.matmul %14, %15, %cst {dimension_numbers = #tpu.dot_dimension_numbers<[1], [0], [0], [1], [0, 0, 1, 1], [], []>} : vector<16x216xbf16>, vector<216x64xbf16>, vector<16x64xf32> -> vector<16x64xf32>
    %c0_5 = arith.constant 0 : index
    %c0_6 = arith.constant 0 : index
    %17 = vector.load %arg3[%c0_5, %c0_6] : memref<1x8xf32, #tpu.memory_space<vmem>>, vector<1x8xf32>
    %18 = tpu.concatenate %17, %17, %17, %17, %17, %17, %17, %17 in 1 : vector<1x8xf32>, vector<1x8xf32>, vector<1x8xf32>, vector<1x8xf32>, vector<1x8xf32>, vector<1x8xf32>, vector<1x8xf32>, vector<1x8xf32> -> vector<1x64xf32>
    %19 = vector.broadcast %18 : vector<1x64xf32> to vector<16x64xf32>
    %20 = arith.addf %16, %19 : vector<16x64xf32>
    %cst_7 = arith.constant 0.000000e+00 : f32
    %21 = vector.broadcast %cst_7 : f32 to vector<16x64xf32>
    %22 = arith.cmpf oge, %20, %21 : vector<16x64xf32>
    %cst_8 = arith.constant 0.00999999977 : f32
    %23 = vector.broadcast %cst_8 : f32 to vector<16x64xf32>
    %24 = arith.mulf %23, %20 : vector<16x64xf32>
    %25 = arith.select %22, %20, %24 : vector<16x64xi1>, vector<16x64xf32>
    %26 = arith.truncf %25 : vector<16x64xf32> to vector<16x64xbf16>
    %cst_9 = arith.constant 0.000000e+00 : bf16
    %27 = vector.broadcast %cst_9 : bf16 to vector<1x64xbf16>
    %28 = vector.extract_strided_slice %26 {offsets = [0, 0], sizes = [1, 64], strides = [1, 1]} : vector<16x64xbf16> to vector<1x64xbf16>
    %29 = vector.extract_strided_slice %26 {offsets = [2, 0], sizes = [1, 64], strides = [1, 1]} : vector<16x64xbf16> to vector<1x64xbf16>
    %30 = vector.extract_strided_slice %26 {offsets = [4, 0], sizes = [1, 64], strides = [1, 1]} : vector<16x64xbf16> to vector<1x64xbf16>
    %31 = vector.extract_strided_slice %26 {offsets = [6, 0], sizes = [1, 64], strides = [1, 1]} : vector<16x64xbf16> to vector<1x64xbf16>
    %32 = vector.extract_strided_slice %26 {offsets = [1, 0], sizes = [1, 64], strides = [1, 1]} : vector<16x64xbf16> to vector<1x64xbf16>
    %33 = vector.extract_strided_slice %26 {offsets = [3, 0], sizes = [1, 64], strides = [1, 1]} : vector<16x64xbf16> to vector<1x64xbf16>
    %34 = vector.extract_strided_slice %26 {offsets = [5, 0], sizes = [1, 64], strides = [1, 1]} : vector<16x64xbf16> to vector<1x64xbf16>
    %35 = vector.extract_strided_slice %26 {offsets = [7, 0], sizes = [1, 64], strides = [1, 1]} : vector<16x64xbf16> to vector<1x64xbf16>
    %36 = vector.extract_strided_slice %26 {offsets = [8, 0], sizes = [1, 64], strides = [1, 1]} : vector<16x64xbf16> to vector<1x64xbf16>
    %37 = vector.extract_strided_slice %26 {offsets = [10, 0], sizes = [1, 64], strides = [1, 1]} : vector<16x64xbf16> to vector<1x64xbf16>
    %38 = vector.extract_strided_slice %26 {offsets = [12, 0], sizes = [1, 64], strides = [1, 1]} : vector<16x64xbf16> to vector<1x64xbf16>
    %39 = vector.extract_strided_slice %26 {offsets = [14, 0], sizes = [1, 64], strides = [1, 1]} : vector<16x64xbf16> to vector<1x64xbf16>
    %40 = vector.extract_strided_slice %26 {offsets = [9, 0], sizes = [1, 64], strides = [1, 1]} : vector<16x64xbf16> to vector<1x64xbf16>
    %41 = vector.extract_strided_slice %26 {offsets = [11, 0], sizes = [1, 64], strides = [1, 1]} : vector<16x64xbf16> to vector<1x64xbf16>
    %42 = vector.extract_strided_slice %26 {offsets = [13, 0], sizes = [1, 64], strides = [1, 1]} : vector<16x64xbf16> to vector<1x64xbf16>
    %43 = vector.extract_strided_slice %26 {offsets = [15, 0], sizes = [1, 64], strides = [1, 1]} : vector<16x64xbf16> to vector<1x64xbf16>
    %44 = tpu.concatenate %27, %32, %33, %34, %35, %27, %40, %41, %42, %43 in 0 : vector<1x64xbf16>, vector<1x64xbf16>, vector<1x64xbf16>, vector<1x64xbf16>, vector<1x64xbf16>, vector<1x64xbf16>, vector<1x64xbf16>, vector<1x64xbf16>, vector<1x64xbf16>, vector<1x64xbf16> -> vector<10x64xbf16>
    %45 = tpu.concatenate %28, %29, %30, %31, %27, %36, %37, %38, %39, %27 in 0 : vector<1x64xbf16>, vector<1x64xbf16>, vector<1x64xbf16>, vector<1x64xbf16>, vector<1x64xbf16>, vector<1x64xbf16>, vector<1x64xbf16>, vector<1x64xbf16>, vector<1x64xbf16>, vector<1x64xbf16> -> vector<10x64xbf16>
    %cst_10 = arith.constant 0.000000e+00 : bf16
    %46 = vector.broadcast %cst_10 : bf16 to vector<10x8xbf16>
    %47 = tpu.concatenate %46, %44, %46 in 1 : vector<10x8xbf16>, vector<10x64xbf16>, vector<10x8xbf16> -> vector<10x80xbf16>
    %48 = tpu.concatenate %46, %45, %46 in 1 : vector<10x8xbf16>, vector<10x64xbf16>, vector<10x8xbf16> -> vector<10x80xbf16>
    %49 = vector.extract_strided_slice %47 {offsets = [0, 0], sizes = [4, 80], strides = [1, 1]} : vector<10x80xbf16> to vector<4x80xbf16>
    %50 = vector.extract_strided_slice %47 {offsets = [5, 0], sizes = [4, 80], strides = [1, 1]} : vector<10x80xbf16> to vector<4x80xbf16>
    %51 = tpu.concatenate %49, %50 in 0 : vector<4x80xbf16>, vector<4x80xbf16> -> vector<8x80xbf16>
    %52 = vector.extract_strided_slice %48 {offsets = [0, 0], sizes = [4, 80], strides = [1, 1]} : vector<10x80xbf16> to vector<4x80xbf16>
    %53 = vector.extract_strided_slice %48 {offsets = [5, 0], sizes = [4, 80], strides = [1, 1]} : vector<10x80xbf16> to vector<4x80xbf16>
    %54 = tpu.concatenate %52, %53 in 0 : vector<4x80xbf16>, vector<4x80xbf16> -> vector<8x80xbf16>
    %55 = vector.extract_strided_slice %47 {offsets = [1, 0], sizes = [4, 80], strides = [1, 1]} : vector<10x80xbf16> to vector<4x80xbf16>
    %56 = vector.extract_strided_slice %47 {offsets = [6, 0], sizes = [4, 80], strides = [1, 1]} : vector<10x80xbf16> to vector<4x80xbf16>
    %57 = tpu.concatenate %55, %56 in 0 : vector<4x80xbf16>, vector<4x80xbf16> -> vector<8x80xbf16>
    %58 = vector.extract_strided_slice %48 {offsets = [1, 0], sizes = [4, 80], strides = [1, 1]} : vector<10x80xbf16> to vector<4x80xbf16>
    %59 = vector.extract_strided_slice %48 {offsets = [6, 0], sizes = [4, 80], strides = [1, 1]} : vector<10x80xbf16> to vector<4x80xbf16>
    %60 = tpu.concatenate %58, %59 in 0 : vector<4x80xbf16>, vector<4x80xbf16> -> vector<8x80xbf16>
    %61 = tpu.concatenate %51, %54, %57, %60 in 1 : vector<8x80xbf16>, vector<8x80xbf16>, vector<8x80xbf16>, vector<8x80xbf16> -> vector<8x320xbf16>
    %c0_11 = arith.constant 0 : index
    %c0_12 = arith.constant 0 : index
    %62 = vector.load %arg4[%c0_11, %c0_12] : memref<320x64xbf16, #tpu.memory_space<vmem>>, vector<320x64xbf16>
    %cst_13 = arith.constant dense<0.000000e+00> : vector<8x64xf32>
    %63 = tpu.matmul %61, %62, %cst_13 {dimension_numbers = #tpu.dot_dimension_numbers<[1], [0], [0], [1], [0, 0, 1, 1], [], []>} : vector<8x320xbf16>, vector<320x64xbf16>, vector<8x64xf32> -> vector<8x64xf32>
    %c0_14 = arith.constant 0 : index
    %c0_15 = arith.constant 0 : index
    %64 = vector.load %arg5[%c0_14, %c0_15] : memref<1x16xf32, #tpu.memory_space<vmem>>, vector<1x16xf32>
    %c0_16 = arith.constant 0 : index
    %c0_17 = arith.constant 0 : index
    %65 = vector.load %arg6[%c0_16, %c0_17] : memref<1x16xf32, #tpu.memory_space<vmem>>, vector<1x16xf32>
    %cst_18 = arith.constant dense<0.000000e+00> : vector<64xf32>
    %66 = vector.multi_reduction <add>, %63, %cst_18 [0] : vector<8x64xf32> to vector<64xf32>
    %67 = vector.shape_cast %66 : vector<64xf32> to vector<1x64xf32>
    %68 = arith.mulf %63, %63 : vector<8x64xf32>
    %cst_19 = arith.constant dense<0.000000e+00> : vector<64xf32>
    %69 = vector.multi_reduction <add>, %68, %cst_19 [0] : vector<8x64xf32> to vector<64xf32>
    %70 = vector.shape_cast %69 : vector<64xf32> to vector<1x64xf32>
    %71 = vector.extract_strided_slice %67 {offsets = [0, 0], sizes = [1, 16], strides = [1, 1]} : vector<1x64xf32> to vector<1x16xf32>
    %72 = vector.extract_strided_slice %67 {offsets = [0, 16], sizes = [1, 16], strides = [1, 1]} : vector<1x64xf32> to vector<1x16xf32>
    %73 = arith.addf %71, %72 : vector<1x16xf32>
    %74 = vector.extract_strided_slice %67 {offsets = [0, 32], sizes = [1, 16], strides = [1, 1]} : vector<1x64xf32> to vector<1x16xf32>
    %75 = arith.addf %73, %74 : vector<1x16xf32>
    %76 = vector.extract_strided_slice %67 {offsets = [0, 48], sizes = [1, 16], strides = [1, 1]} : vector<1x64xf32> to vector<1x16xf32>
    %77 = arith.addf %75, %76 : vector<1x16xf32>
    %cst_20 = arith.constant 3.200000e+01 : f32
    %78 = vector.broadcast %cst_20 : f32 to vector<1x16xf32>
    %79 = arith.divf %77, %78 : vector<1x16xf32>
    %80 = vector.extract_strided_slice %70 {offsets = [0, 0], sizes = [1, 16], strides = [1, 1]} : vector<1x64xf32> to vector<1x16xf32>
    %81 = vector.extract_strided_slice %70 {offsets = [0, 16], sizes = [1, 16], strides = [1, 1]} : vector<1x64xf32> to vector<1x16xf32>
    %82 = arith.addf %80, %81 : vector<1x16xf32>
    %83 = vector.extract_strided_slice %70 {offsets = [0, 32], sizes = [1, 16], strides = [1, 1]} : vector<1x64xf32> to vector<1x16xf32>
    %84 = arith.addf %82, %83 : vector<1x16xf32>
    %85 = vector.extract_strided_slice %70 {offsets = [0, 48], sizes = [1, 16], strides = [1, 1]} : vector<1x64xf32> to vector<1x16xf32>
    %86 = arith.addf %84, %85 : vector<1x16xf32>
    %cst_21 = arith.constant 3.200000e+01 : f32
    %87 = vector.broadcast %cst_21 : f32 to vector<1x16xf32>
    %88 = arith.divf %86, %87 : vector<1x16xf32>
    %89 = arith.mulf %79, %79 : vector<1x16xf32>
    %90 = arith.subf %88, %89 : vector<1x16xf32>
    %cst_22 = arith.constant 0.000000e+00 : f32
    %91 = vector.broadcast %cst_22 : f32 to vector<1x16xf32>
    %92 = arith.maximumf %90, %91 : vector<1x16xf32>
    %cst_23 = arith.constant 9.99999974E-6 : f32
    %93 = vector.broadcast %cst_23 : f32 to vector<1x16xf32>
    %94 = arith.addf %92, %93 : vector<1x16xf32>
    %95 = math.rsqrt %94 : vector<1x16xf32>
    %96 = arith.mulf %64, %95 : vector<1x16xf32>
    %97 = arith.mulf %79, %96 : vector<1x16xf32>
    %98 = arith.subf %65, %97 : vector<1x16xf32>
    %99 = tpu.concatenate %96, %96, %96, %96 in 1 : vector<1x16xf32>, vector<1x16xf32>, vector<1x16xf32>, vector<1x16xf32> -> vector<1x64xf32>
    %100 = vector.broadcast %99 : vector<1x64xf32> to vector<8x64xf32>
    %101 = arith.mulf %63, %100 : vector<8x64xf32>
    %102 = tpu.concatenate %98, %98, %98, %98 in 1 : vector<1x16xf32>, vector<1x16xf32>, vector<1x16xf32>, vector<1x16xf32> -> vector<1x64xf32>
    %103 = vector.broadcast %102 : vector<1x64xf32> to vector<8x64xf32>
    %104 = arith.addf %101, %103 : vector<8x64xf32>
    %cst_24 = arith.constant 0.000000e+00 : f32
    %105 = vector.broadcast %cst_24 : f32 to vector<8x64xf32>
    %106 = arith.cmpf oge, %104, %105 : vector<8x64xf32>
    %cst_25 = arith.constant 0.00999999977 : f32
    %107 = vector.broadcast %cst_25 : f32 to vector<8x64xf32>
    %108 = arith.mulf %107, %104 : vector<8x64xf32>
    %109 = arith.select %106, %104, %108 : vector<8x64xi1>, vector<8x64xf32>
    %110 = arith.truncf %109 : vector<8x64xf32> to vector<8x64xbf16>
    %cst_26 = arith.constant 0.000000e+00 : bf16
    %111 = vector.broadcast %cst_26 : bf16 to vector<1x64xbf16>
    %112 = vector.extract_strided_slice %110 {offsets = [0, 0], sizes = [1, 64], strides = [1, 1]} : vector<8x64xbf16> to vector<1x64xbf16>
    %113 = vector.extract_strided_slice %110 {offsets = [2, 0], sizes = [1, 64], strides = [1, 1]} : vector<8x64xbf16> to vector<1x64xbf16>
    %114 = vector.extract_strided_slice %110 {offsets = [1, 0], sizes = [1, 64], strides = [1, 1]} : vector<8x64xbf16> to vector<1x64xbf16>
    %115 = vector.extract_strided_slice %110 {offsets = [3, 0], sizes = [1, 64], strides = [1, 1]} : vector<8x64xbf16> to vector<1x64xbf16>
    %116 = vector.extract_strided_slice %110 {offsets = [4, 0], sizes = [1, 64], strides = [1, 1]} : vector<8x64xbf16> to vector<1x64xbf16>
    %117 = vector.extract_strided_slice %110 {offsets = [6, 0], sizes = [1, 64], strides = [1, 1]} : vector<8x64xbf16> to vector<1x64xbf16>
    %118 = vector.extract_strided_slice %110 {offsets = [5, 0], sizes = [1, 64], strides = [1, 1]} : vector<8x64xbf16> to vector<1x64xbf16>
    %119 = vector.extract_strided_slice %110 {offsets = [7, 0], sizes = [1, 64], strides = [1, 1]} : vector<8x64xbf16> to vector<1x64xbf16>
    %120 = tpu.concatenate %111, %114, %115, %111, %118, %119 in 0 : vector<1x64xbf16>, vector<1x64xbf16>, vector<1x64xbf16>, vector<1x64xbf16>, vector<1x64xbf16>, vector<1x64xbf16> -> vector<6x64xbf16>
    %121 = tpu.concatenate %112, %113, %111, %116, %117, %111 in 0 : vector<1x64xbf16>, vector<1x64xbf16>, vector<1x64xbf16>, vector<1x64xbf16>, vector<1x64xbf16>, vector<1x64xbf16> -> vector<6x64xbf16>
    %cst_27 = arith.constant 0.000000e+00 : bf16
    %122 = vector.broadcast %cst_27 : bf16 to vector<6x16xbf16>
    %123 = tpu.concatenate %122, %120, %122 in 1 : vector<6x16xbf16>, vector<6x64xbf16>, vector<6x16xbf16> -> vector<6x96xbf16>
    %124 = tpu.concatenate %122, %121, %122 in 1 : vector<6x16xbf16>, vector<6x64xbf16>, vector<6x16xbf16> -> vector<6x96xbf16>
    %125 = vector.extract_strided_slice %123 {offsets = [0, 0], sizes = [2, 96], strides = [1, 1]} : vector<6x96xbf16> to vector<2x96xbf16>
    %126 = vector.extract_strided_slice %123 {offsets = [3, 0], sizes = [2, 96], strides = [1, 1]} : vector<6x96xbf16> to vector<2x96xbf16>
    %127 = tpu.concatenate %125, %126 in 0 : vector<2x96xbf16>, vector<2x96xbf16> -> vector<4x96xbf16>
    %128 = vector.extract_strided_slice %124 {offsets = [0, 0], sizes = [2, 96], strides = [1, 1]} : vector<6x96xbf16> to vector<2x96xbf16>
    %129 = vector.extract_strided_slice %124 {offsets = [3, 0], sizes = [2, 96], strides = [1, 1]} : vector<6x96xbf16> to vector<2x96xbf16>
    %130 = tpu.concatenate %128, %129 in 0 : vector<2x96xbf16>, vector<2x96xbf16> -> vector<4x96xbf16>
    %131 = vector.extract_strided_slice %123 {offsets = [1, 0], sizes = [2, 96], strides = [1, 1]} : vector<6x96xbf16> to vector<2x96xbf16>
    %132 = vector.extract_strided_slice %123 {offsets = [4, 0], sizes = [2, 96], strides = [1, 1]} : vector<6x96xbf16> to vector<2x96xbf16>
    %133 = tpu.concatenate %131, %132 in 0 : vector<2x96xbf16>, vector<2x96xbf16> -> vector<4x96xbf16>
    %134 = vector.extract_strided_slice %124 {offsets = [1, 0], sizes = [2, 96], strides = [1, 1]} : vector<6x96xbf16> to vector<2x96xbf16>
    %135 = vector.extract_strided_slice %124 {offsets = [4, 0], sizes = [2, 96], strides = [1, 1]} : vector<6x96xbf16> to vector<2x96xbf16>
    %136 = tpu.concatenate %134, %135 in 0 : vector<2x96xbf16>, vector<2x96xbf16> -> vector<4x96xbf16>
    %137 = tpu.concatenate %127, %130, %133, %136 in 1 : vector<4x96xbf16>, vector<4x96xbf16>, vector<4x96xbf16>, vector<4x96xbf16> -> vector<4x384xbf16>
    %c0_28 = arith.constant 0 : index
    %c0_29 = arith.constant 0 : index
    %138 = vector.load %arg7[%c0_28, %c0_29] : memref<384x64xbf16, #tpu.memory_space<vmem>>, vector<384x64xbf16>
    %cst_30 = arith.constant dense<0.000000e+00> : vector<4x64xf32>
    %139 = tpu.matmul %137, %138, %cst_30 {dimension_numbers = #tpu.dot_dimension_numbers<[1], [0], [0], [1], [0, 0, 1, 1], [], []>} : vector<4x384xbf16>, vector<384x64xbf16>, vector<4x64xf32> -> vector<4x64xf32>
    %c0_31 = arith.constant 0 : index
    %c0_32 = arith.constant 0 : index
    %140 = vector.load %arg8[%c0_31, %c0_32] : memref<1x32xf32, #tpu.memory_space<vmem>>, vector<1x32xf32>
    %c0_33 = arith.constant 0 : index
    %c0_34 = arith.constant 0 : index
    %141 = vector.load %arg9[%c0_33, %c0_34] : memref<1x32xf32, #tpu.memory_space<vmem>>, vector<1x32xf32>
    %cst_35 = arith.constant dense<0.000000e+00> : vector<64xf32>
    %142 = vector.multi_reduction <add>, %139, %cst_35 [0] : vector<4x64xf32> to vector<64xf32>
    %143 = vector.shape_cast %142 : vector<64xf32> to vector<1x64xf32>
    %144 = arith.mulf %139, %139 : vector<4x64xf32>
    %cst_36 = arith.constant dense<0.000000e+00> : vector<64xf32>
    %145 = vector.multi_reduction <add>, %144, %cst_36 [0] : vector<4x64xf32> to vector<64xf32>
    %146 = vector.shape_cast %145 : vector<64xf32> to vector<1x64xf32>
    %147 = vector.extract_strided_slice %143 {offsets = [0, 0], sizes = [1, 32], strides = [1, 1]} : vector<1x64xf32> to vector<1x32xf32>
    %148 = vector.extract_strided_slice %143 {offsets = [0, 32], sizes = [1, 32], strides = [1, 1]} : vector<1x64xf32> to vector<1x32xf32>
    %149 = arith.addf %147, %148 : vector<1x32xf32>
    %cst_37 = arith.constant 8.000000e+00 : f32
    %150 = vector.broadcast %cst_37 : f32 to vector<1x32xf32>
    %151 = arith.divf %149, %150 : vector<1x32xf32>
    %152 = vector.extract_strided_slice %146 {offsets = [0, 0], sizes = [1, 32], strides = [1, 1]} : vector<1x64xf32> to vector<1x32xf32>
    %153 = vector.extract_strided_slice %146 {offsets = [0, 32], sizes = [1, 32], strides = [1, 1]} : vector<1x64xf32> to vector<1x32xf32>
    %154 = arith.addf %152, %153 : vector<1x32xf32>
    %cst_38 = arith.constant 8.000000e+00 : f32
    %155 = vector.broadcast %cst_38 : f32 to vector<1x32xf32>
    %156 = arith.divf %154, %155 : vector<1x32xf32>
    %157 = arith.mulf %151, %151 : vector<1x32xf32>
    %158 = arith.subf %156, %157 : vector<1x32xf32>
    %cst_39 = arith.constant 0.000000e+00 : f32
    %159 = vector.broadcast %cst_39 : f32 to vector<1x32xf32>
    %160 = arith.maximumf %158, %159 : vector<1x32xf32>
    %cst_40 = arith.constant 9.99999974E-6 : f32
    %161 = vector.broadcast %cst_40 : f32 to vector<1x32xf32>
    %162 = arith.addf %160, %161 : vector<1x32xf32>
    %163 = math.rsqrt %162 : vector<1x32xf32>
    %164 = arith.mulf %140, %163 : vector<1x32xf32>
    %165 = arith.mulf %151, %164 : vector<1x32xf32>
    %166 = arith.subf %141, %165 : vector<1x32xf32>
    %167 = tpu.concatenate %164, %164 in 1 : vector<1x32xf32>, vector<1x32xf32> -> vector<1x64xf32>
    %168 = vector.broadcast %167 : vector<1x64xf32> to vector<4x64xf32>
    %169 = arith.mulf %139, %168 : vector<4x64xf32>
    %170 = tpu.concatenate %166, %166 in 1 : vector<1x32xf32>, vector<1x32xf32> -> vector<1x64xf32>
    %171 = vector.broadcast %170 : vector<1x64xf32> to vector<4x64xf32>
    %172 = arith.addf %169, %171 : vector<4x64xf32>
    %cst_41 = arith.constant 0.000000e+00 : f32
    %173 = vector.broadcast %cst_41 : f32 to vector<4x64xf32>
    %174 = arith.cmpf oge, %172, %173 : vector<4x64xf32>
    %cst_42 = arith.constant 0.00999999977 : f32
    %175 = vector.broadcast %cst_42 : f32 to vector<4x64xf32>
    %176 = arith.mulf %175, %172 : vector<4x64xf32>
    %177 = arith.select %174, %172, %176 : vector<4x64xi1>, vector<4x64xf32>
    %178 = arith.truncf %177 : vector<4x64xf32> to vector<4x64xbf16>
    %cst_43 = arith.constant 0.000000e+00 : bf16
    %179 = vector.broadcast %cst_43 : bf16 to vector<1x64xbf16>
    %180 = vector.extract_strided_slice %178 {offsets = [0, 0], sizes = [1, 64], strides = [1, 1]} : vector<4x64xbf16> to vector<1x64xbf16>
    %181 = vector.extract_strided_slice %178 {offsets = [1, 0], sizes = [1, 64], strides = [1, 1]} : vector<4x64xbf16> to vector<1x64xbf16>
    %182 = vector.extract_strided_slice %178 {offsets = [2, 0], sizes = [1, 64], strides = [1, 1]} : vector<4x64xbf16> to vector<1x64xbf16>
    %183 = vector.extract_strided_slice %178 {offsets = [3, 0], sizes = [1, 64], strides = [1, 1]} : vector<4x64xbf16> to vector<1x64xbf16>
    %184 = tpu.concatenate %179, %181, %179, %183 in 0 : vector<1x64xbf16>, vector<1x64xbf16>, vector<1x64xbf16>, vector<1x64xbf16> -> vector<4x64xbf16>
    %185 = tpu.concatenate %180, %179, %182, %179 in 0 : vector<1x64xbf16>, vector<1x64xbf16>, vector<1x64xbf16>, vector<1x64xbf16> -> vector<4x64xbf16>
    %cst_44 = arith.constant 0.000000e+00 : bf16
    %186 = vector.broadcast %cst_44 : bf16 to vector<4x32xbf16>
    %187 = tpu.concatenate %186, %184, %186 in 1 : vector<4x32xbf16>, vector<4x64xbf16>, vector<4x32xbf16> -> vector<4x128xbf16>
    %188 = tpu.concatenate %186, %185, %186 in 1 : vector<4x32xbf16>, vector<4x64xbf16>, vector<4x32xbf16> -> vector<4x128xbf16>
    %189 = vector.extract_strided_slice %187 {offsets = [0, 0], sizes = [1, 128], strides = [1, 1]} : vector<4x128xbf16> to vector<1x128xbf16>
    %190 = vector.extract_strided_slice %187 {offsets = [2, 0], sizes = [1, 128], strides = [1, 1]} : vector<4x128xbf16> to vector<1x128xbf16>
    %191 = tpu.concatenate %189, %190 in 0 : vector<1x128xbf16>, vector<1x128xbf16> -> vector<2x128xbf16>
    %192 = vector.extract_strided_slice %188 {offsets = [0, 0], sizes = [1, 128], strides = [1, 1]} : vector<4x128xbf16> to vector<1x128xbf16>
    %193 = vector.extract_strided_slice %188 {offsets = [2, 0], sizes = [1, 128], strides = [1, 1]} : vector<4x128xbf16> to vector<1x128xbf16>
    %194 = tpu.concatenate %192, %193 in 0 : vector<1x128xbf16>, vector<1x128xbf16> -> vector<2x128xbf16>
    %195 = vector.extract_strided_slice %187 {offsets = [1, 0], sizes = [1, 128], strides = [1, 1]} : vector<4x128xbf16> to vector<1x128xbf16>
    %196 = vector.extract_strided_slice %187 {offsets = [3, 0], sizes = [1, 128], strides = [1, 1]} : vector<4x128xbf16> to vector<1x128xbf16>
    %197 = tpu.concatenate %195, %196 in 0 : vector<1x128xbf16>, vector<1x128xbf16> -> vector<2x128xbf16>
    %198 = vector.extract_strided_slice %188 {offsets = [1, 0], sizes = [1, 128], strides = [1, 1]} : vector<4x128xbf16> to vector<1x128xbf16>
    %199 = vector.extract_strided_slice %188 {offsets = [3, 0], sizes = [1, 128], strides = [1, 1]} : vector<4x128xbf16> to vector<1x128xbf16>
    %200 = tpu.concatenate %198, %199 in 0 : vector<1x128xbf16>, vector<1x128xbf16> -> vector<2x128xbf16>
    %201 = tpu.concatenate %191, %194, %197, %200 in 1 : vector<2x128xbf16>, vector<2x128xbf16>, vector<2x128xbf16>, vector<2x128xbf16> -> vector<2x512xbf16>
    %c0_45 = arith.constant 0 : index
    %c0_46 = arith.constant 0 : index
    %202 = vector.load %arg10[%c0_45, %c0_46] : memref<512x64xbf16, #tpu.memory_space<vmem>>, vector<512x64xbf16>
    %cst_47 = arith.constant dense<0.000000e+00> : vector<2x64xf32>
    %203 = tpu.matmul %201, %202, %cst_47 {dimension_numbers = #tpu.dot_dimension_numbers<[1], [0], [0], [1], [0, 0, 1, 1], [], []>} : vector<2x512xbf16>, vector<512x64xbf16>, vector<2x64xf32> -> vector<2x64xf32>
    %c0_48 = arith.constant 0 : index
    %c0_49 = arith.constant 0 : index
    %204 = vector.load %arg11[%c0_48, %c0_49] : memref<1x64xf32, #tpu.memory_space<vmem>>, vector<1x64xf32>
    %c0_50 = arith.constant 0 : index
    %c0_51 = arith.constant 0 : index
    %205 = vector.load %arg12[%c0_50, %c0_51] : memref<1x64xf32, #tpu.memory_space<vmem>>, vector<1x64xf32>
    %cst_52 = arith.constant dense<0.000000e+00> : vector<64xf32>
    %206 = vector.multi_reduction <add>, %203, %cst_52 [0] : vector<2x64xf32> to vector<64xf32>
    %207 = vector.shape_cast %206 : vector<64xf32> to vector<1x64xf32>
    %208 = arith.mulf %203, %203 : vector<2x64xf32>
    %cst_53 = arith.constant dense<0.000000e+00> : vector<64xf32>
    %209 = vector.multi_reduction <add>, %208, %cst_53 [0] : vector<2x64xf32> to vector<64xf32>
    %210 = vector.shape_cast %209 : vector<64xf32> to vector<1x64xf32>
    %cst_54 = arith.constant 2.000000e+00 : f32
    %211 = vector.broadcast %cst_54 : f32 to vector<1x64xf32>
    %212 = arith.divf %207, %211 : vector<1x64xf32>
    %cst_55 = arith.constant 2.000000e+00 : f32
    %213 = vector.broadcast %cst_55 : f32 to vector<1x64xf32>
    %214 = arith.divf %210, %213 : vector<1x64xf32>
    %215 = arith.mulf %212, %212 : vector<1x64xf32>
    %216 = arith.subf %214, %215 : vector<1x64xf32>
    %cst_56 = arith.constant 0.000000e+00 : f32
    %217 = vector.broadcast %cst_56 : f32 to vector<1x64xf32>
    %218 = arith.maximumf %216, %217 : vector<1x64xf32>
    %cst_57 = arith.constant 9.99999974E-6 : f32
    %219 = vector.broadcast %cst_57 : f32 to vector<1x64xf32>
    %220 = arith.addf %218, %219 : vector<1x64xf32>
    %221 = math.rsqrt %220 : vector<1x64xf32>
    %222 = arith.mulf %204, %221 : vector<1x64xf32>
    %223 = arith.mulf %212, %222 : vector<1x64xf32>
    %224 = arith.subf %205, %223 : vector<1x64xf32>
    %225 = vector.broadcast %222 : vector<1x64xf32> to vector<2x64xf32>
    %226 = arith.mulf %203, %225 : vector<2x64xf32>
    %227 = vector.broadcast %224 : vector<1x64xf32> to vector<2x64xf32>
    %228 = arith.addf %226, %227 : vector<2x64xf32>
    %cst_58 = arith.constant 0.000000e+00 : f32
    %229 = vector.broadcast %cst_58 : f32 to vector<2x64xf32>
    %230 = arith.cmpf oge, %228, %229 : vector<2x64xf32>
    %cst_59 = arith.constant 0.00999999977 : f32
    %231 = vector.broadcast %cst_59 : f32 to vector<2x64xf32>
    %232 = arith.mulf %231, %228 : vector<2x64xf32>
    %233 = arith.select %230, %228, %232 : vector<2x64xi1>, vector<2x64xf32>
    %cst_60 = arith.constant 5.000000e-01 : f32
    %234 = vector.broadcast %cst_60 : f32 to vector<2x64xf32>
    %235 = arith.mulf %234, %233 : vector<2x64xf32>
    %236 = math.tanh %235 : vector<2x64xf32>
    %cst_61 = arith.constant 1.000000e+00 : f32
    %237 = vector.broadcast %cst_61 : f32 to vector<2x64xf32>
    %238 = arith.addf %236, %237 : vector<2x64xf32>
    %cst_62 = arith.constant 5.000000e-01 : f32
    %239 = vector.broadcast %cst_62 : f32 to vector<2x64xf32>
    %240 = arith.mulf %239, %238 : vector<2x64xf32>
    %cst_63 = arith.constant dense<0.000000e+00> : vector<2xf32>
    %241 = vector.multi_reduction <add>, %240, %cst_63 [1] : vector<2x64xf32> to vector<2xf32>
    %242 = vector.shape_cast %241 : vector<2xf32> to vector<2x1xf32>
    %cst_64 = arith.constant 6.400000e+01 : f32
    %243 = vector.broadcast %cst_64 : f32 to vector<2x1xf32>
    %244 = arith.divf %242, %243 : vector<2x1xf32>
    %c0_65 = arith.constant 0 : index
    %c0_66 = arith.constant 0 : index
    %245 = vector.load %arg13[%c0_65, %c0_66] : memref<2x1xf32, #tpu.memory_space<vmem>>, vector<2x1xf32>
    tpu.vector_store %arg13[%c0_65, %c0_66], %244 {strides = array<i32>} : memref<2x1xf32, #tpu.memory_space<vmem>>, vector<2x1xf32>,
    return
  }
}

</mosaic_0001>

<bundles_post_ra>
// kernel: squeeze.3
= control target key start
LH: loop header
LB: loop body
LE: loop exit
PB: predicated region body
PF: predicated region fallthrough
CT: control target
= control target key end

     0   :  { %s949_s21 = smov 48  ;;  %vm868_vm0 = vcmask 1045508   ;;  %vm814_vm1 = vcmask 1047556   ;;  %s1099_s15 = smov 9   ;;  %vm816_vm2 = vcmask 72704   ;;  %vm937_vm3 = vcmask 1047558   ;;  %s1317_s0 = inlined_call_operand.vmem [shape: bf16[1,2,9,2,9,3], index: 0, kind: input, shape index: {}]   ;;  %s1318_s1 = inlined_call_operand.vmem [shape: bf16[18,54], index: 1, kind: output, shape index: {}]  }
   0x1   :  { %v1027_v0 = vld [vmem:[%s1317_s0 + $0x21] sm:$0x1]  ;;  %v1028_v1 = vld [vmem:[%s1317_s0 + $0x20] sm:$0x1]  ;;  %v1029_v2 = vld [vmem:[%s1317_s0 + $0x1f] sm:$0x1] }
   0x2   :  { %v315_v3 = vunpack.c.l.bf16 %v1027_v0  ;;  %v330_v4 = vunpack.c.l.bf16 %v1028_v1  ;;  %v345_v5 = vunpack.c.l.bf16 %v1029_v2  ;;  %v1030_v6 = vld [vmem:[%s1317_s0 + $0x1e] sm:$0x1]  ;;  %v1031_v7 = vld [vmem:[%s1317_s0 + $0x1d] sm:$0x1]  ;;  %v1032_v8 = vld [vmem:[%s1317_s0 + $0x1c] sm:$0x1] }
   0x3   :  { %v360_v9 = vunpack.c.l.bf16 %v1030_v6  ;;  %v1033_v10 = vld [vmem:[%s1317_s0 + $0x1b] sm:$0x1]  ;;  %v375_v11 = vunpack.c.l.bf16 %v1031_v7  ;;  %v1034_v12 = vld [vmem:[%s1317_s0 + $0x1a] sm:$0x1]  ;;  %v390_v13 = vunpack.c.l.bf16 %v1032_v8  ;;  %v1037_v14 = vld [vmem:[%s1317_s0 + $0x17] sm:$0x1] }
   0x4   :  { %318 = vst [vmem:[#allocation1 + $0x108] sm:$0x3] %v315_v3  ;;  %v405_v15 = vunpack.c.l.bf16 %v1033_v10  ;;  %v1038_v16 = vld [vmem:[%s1317_s0 + $0x16] sm:$0x1]  ;;  %v420_v17 = vunpack.c.l.bf16 %v1034_v12  ;;  %v1039_v18 = vld [vmem:[%s1317_s0 + $0x15] sm:$0x1]  ;;  %v465_v19 = vunpack.c.l.bf16 %v1037_v14 }
   0x5   :  { %333 = vst [vmem:[#allocation1 + $0x100] sm:$0x3] %v330_v4  ;;  %v1040_v20 = vld [vmem:[%s1317_s0 + $0x14] sm:$0x1]  ;;  %v480_v21 = vunpack.c.l.bf16 %v1038_v16  ;;  %v1041_v22 = vld [vmem:[%s1317_s0 + $0x13] sm:$0x1]  ;;  %v495_v23 = vunpack.c.l.bf16 %v1039_v18 }
   0x6   :  { %348 = vst [vmem:[#allocation1 + $0xf8] sm:$0x3] %v345_v5  ;;  %v1042_v24 = vld [vmem:[%s1317_s0 + $0x12] sm:$0x1]  ;;  %v510_v25 = vunpack.c.l.bf16 %v1040_v20  ;;  %v1043_v26 = vld [vmem:[%s1317_s0 + $0x11] sm:$0x1]  ;;  %v525_v27 = vunpack.c.l.bf16 %v1041_v22 }
   0x7   :  { %363 = vst [vmem:[#allocation1 + $0xf0] sm:$0x3] %v360_v9  ;;  %v1044_v28 = vld [vmem:[%s1317_s0 + $0x10] sm:$0x1]  ;;  %v540_v29 = vunpack.c.l.bf16 %v1042_v24  ;;  %v1021_v30 = vld [vmem:[%s1317_s0 + $0x27] sm:$0x1]  ;;  %v555_v31 = vunpack.c.l.bf16 %v1043_v26 }
   0x8   :  { %378 = vst [vmem:[#allocation1 + $0xe8] sm:$0x3] %v375_v11  ;;  %v1022_v32 = vld [vmem:[%s1317_s0 + $0x26] sm:$0x1]  ;;  %v570_v33 = vunpack.c.l.bf16 %v1044_v28  ;;  %v1023_v34 = vld [vmem:[%s1317_s0 + $0x25] sm:$0x1]  ;;  %v225_v35 = vunpack.c.l.bf16 %v1021_v30 }
   0x9   :  { %393 = vst [vmem:[#allocation1 + $0xe0] sm:$0x3] %v390_v13  ;;  %v1024_v36 = vld [vmem:[%s1317_s0 + $0x24] sm:$0x1]  ;;  %v240_v37 = vunpack.c.l.bf16 %v1022_v32  ;;  %v1025_v38 = vld [vmem:[%s1317_s0 + $0x23] sm:$0x1]  ;;  %v255_v39 = vunpack.c.l.bf16 %v1023_v34 }
   0xa   :  { %408 = vst [vmem:[#allocation1 + $0xd8] sm:$0x3] %v405_v15  ;;  %v1026_v40 = vld [vmem:[%s1317_s0 + $0x22] sm:$0x1]  ;;  %v270_v41 = vunpack.c.l.bf16 %v1024_v36  ;;  %v1053_v42 = vld [vmem:[%s1317_s0 + $0x7] sm:$0x1]  ;;  %v285_v43 = vunpack.c.l.bf16 %v1025_v38 }
   0xb   :  { %423 = vst [vmem:[#allocation1 + $0xd0] sm:$0x3] %v420_v17  ;;  %v1054_v44 = vld [vmem:[%s1317_s0 + $0x6] sm:$0x1]  ;;  %v1055_v45 = vld [vmem:[%s1317_s0 + $0x5] sm:$0x1]  ;;  %v300_v47 = vunpack.c.l.bf16 %v1026_v40  ;;  %v705_v49 = vunpack.c.l.bf16 %v1053_v42 }
   0xc   :  { %468 = vst [vmem:[#allocation1 + $0xb8] sm:$0x3] %v465_v19  ;;  %v1056_v50 = vld [vmem:[%s1317_s0 + $0x4] sm:$0x1]  ;;  %v720_v51 = vunpack.c.l.bf16 %v1054_v44  ;;  %v1057_v52 = vld [vmem:[%s1317_s0 + $0x3] sm:$0x1]  ;;  %v735_v55 = vunpack.c.l.bf16 %v1055_v45 }
   0xd   :  { %483 = vst [vmem:[#allocation1 + $0xb0] sm:$0x3] %v480_v21  ;;  %v1058_v53 = vld [vmem:[%s1317_s0 + $0x2] sm:$0x1]  ;;  %v750_v57 = vunpack.c.l.bf16 %v1056_v50  ;;  %v1059_v58 = vld [vmem:[%s1317_s0 + $0x1] sm:$0x1]  ;;  %v765_v61 = vunpack.c.l.bf16 %v1057_v52 }
   0xe   :  { %498 = vst [vmem:[#allocation1 + $0xa8] sm:$0x3] %v495_v23  ;;  %v808_v59 = vld [vmem:[%s1317_s0] sm:$0x1]  ;;  %v780_v63 = vunpack.c.l.bf16 %v1058_v53  ;;  %v1013_v0 = vld [vmem:[%s1317_s0 + $0x2f] sm:$0x1]  ;;  %v795_v2 = vunpack.c.l.bf16 %v1059_v58 }
   0xf   :  { %513 = vst [vmem:[#allocation1 + $0xa0] sm:$0x3] %v510_v25  ;;  %v1014_v3 = vld [vmem:[%s1317_s0 + $0x2e] sm:$0x1]  ;;  %v809_v4 = vunpack.c.l.bf16 %v808_v59  ;;  %v1015_v5 = vld [vmem:[%s1317_s0 + $0x2d] sm:$0x1]  ;;  %v105_v6 = vunpack.c.l.bf16 %v1013_v0 }
  0x10   :  { %528 = vst [vmem:[#allocation1 + $0x98] sm:$0x3] %v525_v27  ;;  %v1016_v7 = vld [vmem:[%s1317_s0 + $0x2c] sm:$0x1]  ;;  %v120_v8 = vunpack.c.l.bf16 %v1014_v3  ;;  %v1017_v9 = vld [vmem:[%s1317_s0 + $0x2b] sm:$0x1]  ;;  %v135_v10 = vunpack.c.l.bf16 %v1015_v5 }
  0x11   :  { %543 = vst [vmem:[#allocation1 + $0x90] sm:$0x3] %v540_v29  ;;  %v1018_v11 = vld [vmem:[%s1317_s0 + $0x2a] sm:$0x1]  ;;  %v150_v12 = vunpack.c.l.bf16 %v1016_v7  ;;  %v1019_v13 = vld [vmem:[%s1317_s0 + $0x29] sm:$0x1]  ;;  %v165_v15 = vunpack.c.l.bf16 %v1017_v9 }
  0x12   :  { %558 = vst [vmem:[#allocation1 + $0x88] sm:$0x3] %v555_v31  ;;  %v947_v46 = vld [vmem:[#allocation1 + $0xd1] ss:$8 sm:$0xf]   ;;  %v180_v19 = vunpack.c.l.bf16 %v1018_v11  ;;  %v195_v21 = vunpack.c.l.bf16 %v1019_v13  ;;  %s935_s30 = smov 192 }
  0x13   :  { %573 = vst [vmem:[#allocation1 + $0x80] sm:$0x3] %v570_v33  ;;  %v950_v48 = vld [vmem:[#allocation1 + $0xd1] ss:$8 sm:%s949_s21]   ;;  %v1020_v14 = vld [vmem:[%s1317_s0 + $0x28] sm:$0x1] }
  0x14   :  { %228 = vst [vmem:[#allocation1 + $0x138] sm:$0x3] %v225_v35  ;;  %v952_v56 = vsel %vm868_vm0, %v950_v48, %v947_v46  ;;  %v1045_v16 = vld [vmem:[%s1317_s0 + $0xf] sm:$0x1]  ;;  %v1046_v17 = vld [vmem:[%s1317_s0 + $0xe] sm:$0x1]  ;;  %v210_v22 = vunpack.c.l.bf16 %v1020_v14 }
  0x15   :  { %243 = vst [vmem:[#allocation1 + $0x130] sm:$0x3] %v240_v37  ;;  %v1047_v23 = vld [vmem:[%s1317_s0 + $0xd] sm:$0x1]  ;;  %v1048_v24 = vld [vmem:[%s1317_s0 + $0xc] sm:$0x1]  ;;  %v585_v26 = vunpack.c.l.bf16 %v1045_v16  ;;  %v600_v28 = vunpack.c.l.bf16 %v1046_v17 }
  0x16   :  { %258 = vst [vmem:[#allocation1 + $0x128] sm:$0x3] %v255_v39  ;;  %v919_v54 = vld [vmem:[#allocation1 + $0x81] ss:$8 sm:$0xf0]   ;;  %v615_v32 = vunpack.c.l.bf16 %v1047_v23  ;;  %v630_v34 = vunpack.c.l.bf16 %v1048_v24  ;;  %vm881_vm4 = vcmask 146504  }
  0x17   :  { %273 = vst [vmem:[#allocation1 + $0x120] sm:$0x3] %v270_v41  ;;  %v1049_v29 = vld [vmem:[%s1317_s0 + $0xb] sm:$0x1]  ;;  %v1050_v30 = vld [vmem:[%s1317_s0 + $0xa] sm:$0x1] }
  0x18   :  { %288 = vst [vmem:[#allocation1 + $0x118] sm:$0x3] %v285_v43  ;;  %v1051_v35 = vld [vmem:[%s1317_s0 + $0x9] sm:$0x1]  ;;  %v645_v37 = vunpack.c.l.bf16 %v1049_v29  ;;  %v1052_v38 = vld [vmem:[%s1317_s0 + $0x8] sm:$0x1]  ;;  %v660_v39 = vunpack.c.l.bf16 %v1050_v30 }
  0x19   :  { %303 = vst [vmem:[#allocation1 + $0x110] sm:$0x3] %v300_v47  ;;  %v1007_v40 = vld [vmem:[%s1317_s0 + $0x35] sm:$0x1]  ;;  %v675_v41 = vunpack.c.l.bf16 %v1051_v35  ;;  %v1008_v42 = vld [vmem:[%s1317_s0 + $0x34] sm:$0x1]  ;;  %v690_v43 = vunpack.c.l.bf16 %v1052_v38 }
  0x1a   :  { %v917_v60 = vld [vmem:[#allocation1 + $0x81] ss:$8 sm:$0xf]   ;;  %708 = vst [vmem:[#allocation1 + $0x38] sm:$0x3] %v705_v49  ;;  %v15_v45 = vunpack.c.l.bf16 %v1007_v40  ;;  %v30_v47 = vunpack.c.l.bf16 %v1008_v42 }
  0x1b   :  { %v921_v62 = vsel %vm814_vm1, %v919_v54, %v917_v60  ;;  %723 = vst [vmem:[#allocation1 + $0x30] sm:$0x3] %v720_v51  ;;  %v1009_v44 = vld [vmem:[%s1317_s0 + $0x33] sm:$0x1]  ;;  %v1010_v46 = vld [vmem:[%s1317_s0 + $0x32] sm:$0x1] }
  0x1c   :  { %v1094_v1 = vpack.i.bf16 %v952_v56, %v921_v62  ;;  %738 = vst [vmem:[#allocation1 + $0x28] sm:$0x3] %v735_v55  ;;  %v1011_v48 = vld [vmem:[%s1317_s0 + $0x31] sm:$0x1]  ;;  %v45_v49 = vunpack.c.l.bf16 %v1009_v44  ;;  %v1012_v50 = vld [vmem:[%s1317_s0 + $0x30] sm:$0x1]  ;;  %v60_v51 = vunpack.c.l.bf16 %v1010_v46 }
  0x1d   :  { %753 = vst [vmem:[#allocation1 + $0x20] sm:$0x3] %v750_v57  ;;  %v1035_v52 = vld [vmem:[%s1317_s0 + $0x19] sm:$0x1]  ;;  %v1036_v53 = vld [vmem:[%s1317_s0 + $0x18] sm:$0x1]  ;;  %v75_v54 = vunpack.c.l.bf16 %v1011_v48  ;;  %v90_v58 = vunpack.c.l.bf16 %v1012_v50 }
  0x1e   :  { %1095 = vrot.lane.b32.xlu1 %v1094_v1, %s1099_s15  ;;  %768 = vst [vmem:[#allocation1 + $0x18] sm:$0x3] %v765_v61  ;;  %v886_v18 = vld [vmem:[#allocation1 + $0x101] ss:$8 sm:$0xf0]   ;;  %v435_v60 = vunpack.c.l.bf16 %v1035_v52  ;;  %v450_v61 = vunpack.c.l.bf16 %v1036_v53  ;;  %s930_s0 = smov 48 }
  0x1f   :  { %783 = vst [vmem:[#allocation1 + $0x10] sm:$0x3] %v780_v63  ;;  %v828_v55 = vld [vmem:[#allocation1 + $0x80] ss:$8 sm:$0xf]  }
  0x20   :  { %798 = vst [vmem:[#allocation1 + $0x8] sm:$0x3] %v795_v2  ;;  %v884_v20 = vld [vmem:[#allocation1 + $0x101] ss:$8 sm:$0xf]  }
  0x21   :  { %811 = vst [vmem:[#allocation1] sm:$0x3] %v809_v4  ;;  %v888_v27 = vsel %vm814_vm1, %v886_v18, %v884_v20  ;;  %v830_v56 = vld [vmem:[#allocation1 + $0x80] ss:$8 sm:$0xf0]  }
  0x22   :  { %108 = vst [vmem:[#allocation1 + $0x178] sm:$0x3] %v105_v6  ;;  %v832_v0 = vsel %vm814_vm1, %v830_v56, %v828_v55  ;;  %v839_v4 = vld [vmem:[#allocation1 + $0xc0] ss:$8 sm:$0xf0]  }
  0x23   :  { %123 = vst [vmem:[#allocation1 + $0x170] sm:$0x3] %v120_v8  ;;  %v848_v16 = vld [vmem:[#allocation1 + $0x100] ss:$8 sm:$0xf0]  }
  0x24   :  { %138 = vst [vmem:[#allocation1 + $0x168] sm:$0x3] %v135_v10  ;;  %v876_v25 = vld [vmem:[#allocation1 + $0x1] ss:$8 sm:$0xf0]  }
  0x25   :  { %153 = vst [vmem:[#allocation1 + $0x160] sm:$0x3] %v150_v12  ;;  %v813_v13 = vld [vmem:[#allocation1] ss:$8 sm:$0xf0]  }
  0x26   :  { %168 = vst [vmem:[#allocation1 + $0x158] sm:$0x3] %v165_v15  ;;  %v846_v15 = vld [vmem:[#allocation1 + $0x100] ss:$8 sm:$0xf]  }
  0x27   :  { %183 = vst [vmem:[#allocation1 + $0x150] sm:$0x3] %v180_v19  ;;  %v850_v17 = vsel %vm814_vm1, %v848_v16, %v846_v15 }
  0x28   :  { %v874_v31 = vld [vmem:[#allocation1 + $0x1] ss:$8 sm:$0xf]   ;;  %198 = vst [vmem:[#allocation1 + $0x148] sm:$0x3] %v195_v21 }
  0x29   :  { %v878_v33 = vsel %vm814_vm1, %v876_v25, %v874_v31  ;;  %213 = vst [vmem:[#allocation1 + $0x140] sm:$0x3] %v210_v22  ;;  %v812_v12 = vld [vmem:[#allocation1] ss:$8 sm:$0xf]  }
  0x2a   :  { %v1084_v36 = vpack.i.bf16 %v888_v27, %v878_v33  ;;  %588 = vst [vmem:[#allocation1 + $0x78] sm:$0x3] %v585_v26  ;;  %v815_v14 = vsel %vm814_vm1, %v813_v13, %v812_v12 }
  0x2b   :  { %603 = vst [vmem:[#allocation1 + $0x70] sm:$0x3] %v600_v28 }
  0x2c   :  { %1085 = vrot.lane.b32.xlu0 %v1084_v36, %s1099_s15  ;;  %618 = vst [vmem:[#allocation1 + $0x68] sm:$0x3] %v615_v32  ;;  %v908_v57 = vld [vmem:[#allocation1 + $0x141] ss:$8 sm:$0xf0]  }
  0x2d   :  { %633 = vst [vmem:[#allocation1 + $0x60] sm:$0x3] %v630_v34  ;;  %v857_v22 = vld [vmem:[#allocation1 + $0x140] ss:$8 sm:$0xf0]  }
  0x2e   :  { %648 = vst [vmem:[#allocation1 + $0x58] sm:$0x3] %v645_v37 }
  0x2f   :  { %663 = vst [vmem:[#allocation1 + $0x50] sm:$0x3] %v660_v39 }
  0x30   :  { %678 = vst [vmem:[#allocation1 + $0x48] sm:$0x3] %v675_v41  ;;  %v906_v59 = vld [vmem:[#allocation1 + $0x141] ss:$8 sm:$0xf]  }
  0x31   :  { %693 = vst [vmem:[#allocation1 + $0x40] sm:$0x3] %v690_v43  ;;  %v910_v63 = vsel %vm814_vm1, %v908_v57, %v906_v59  ;;  %v855_v21 = vld [vmem:[#allocation1 + $0x140] ss:$8 sm:$0xf]  }
  0x32   :  { %18 = vst [vmem:[#allocation1 + $0x1a8] sm:$0x3] %v15_v45  ;;  %v859_v24 = vsel %vm814_vm1, %v857_v22, %v855_v21 }
  0x33   :  { %33 = vst [vmem:[#allocation1 + $0x1a0] sm:$0x3] %v30_v47 }
  0x34   :  { %48 = vst [vmem:[#allocation1 + $0x198] sm:$0x3] %v45_v49  ;;  %v897_v62 = vld [vmem:[#allocation1 + $0x41] ss:$8 sm:$0xf0]  }
  0x35   :  { %63 = vst [vmem:[#allocation1 + $0x190] sm:$0x3] %v60_v51  ;;  %v821_v19 = vld [vmem:[#allocation1 + $0x40] ss:$8 sm:$0xf0]  }
  0x36   :  { %78 = vst [vmem:[#allocation1 + $0x188] sm:$0x3] %v75_v54 }
  0x37   :  { %93 = vst [vmem:[#allocation1 + $0x180] sm:$0x3] %v90_v58 }
  0x38   :  { %v895_v1 = vld [vmem:[#allocation1 + $0x41] ss:$8 sm:$0xf]   ;;  %438 = vst [vmem:[#allocation1 + $0xc8] sm:$0x3] %v435_v60 }
  0x39   :  { %v899_v2 = vsel %vm814_vm1, %v897_v62, %v895_v1  ;;  %453 = vst [vmem:[#allocation1 + $0xc0] sm:$0x3] %v450_v61  ;;  %v819_v18 = vld [vmem:[#allocation1 + $0x40] ss:$8 sm:$0xf]  }
  0x3a   :  { %v1089_v3 = vpack.i.bf16 %v910_v63, %v899_v2  ;;  %835 = vst.msk [vmem:[#allocation0 + $0x10] sm:$0xff] %vm816_vm2, %v832_v0   ;;  %v823_v20 = vsel %vm814_vm1, %v821_v19, %v819_v18 }
  0x3b   :  { %817 = vst.msk [vmem:[#allocation0] sm:$0xff] %vm816_vm2, %v815_v14  }
  0x3c   :  { %1090 = vrot.lane.b32.xlu0 %v1089_v3, %s1099_s15  ;;  %853 = vst.msk [vmem:[#allocation0 + $0x20] sm:$0xff] %vm816_vm2, %v850_v17  }
  0x3d   :  { %826 = vst.msk [vmem:[#allocation0 + $0x8] sm:$0xff] %vm816_vm2, %v823_v20  }
  0x3e   :  { %v928_v5 = vld [vmem:[#allocation1 + $0x181] ss:$8 sm:$0xf]   ;;  %862 = vst.msk [vmem:[#allocation0 + $0x28] sm:$0xff] %vm816_vm2, %v859_v24  }
  0x3f   :  { %v931_v6 = vld [vmem:[#allocation1 + $0x181] ss:$8 sm:%s930_s0]   ;;  %v864_v27 = vld [vmem:[#allocation1 + $0x180] ss:$8 sm:$0xf]  }
  0x40   :  { %v933_v7 = vsel %vm868_vm0, %v931_v6, %v928_v5  ;;  %v936_v8 = vld [vmem:[#allocation1 + $0x91] ss:$8 sm:%s935_s30]   ;;  %v837_v9 = vld [vmem:[#allocation1 + $0xc0] ss:$8 sm:$0xf]  }
  0x41   :  { %v938_v10 = vsel %vm937_vm3, %v936_v8, %v933_v7  ;;  %v841_v11 = vsel %vm814_vm1, %v839_v4, %v837_v9 }
  0x42   :  { %939 = vrot.lane.b32.xlu1 %v938_v10, %s1099_s15  ;;  %844 = vst.msk [vmem:[#allocation0 + $0x18] sm:$0xff] %vm816_vm2, %v841_v11   ;;  %s866_s15 = smov 48 }
  0x43   :  { %v867_v28 = vld [vmem:[#allocation1 + $0x180] ss:$8 sm:%s866_s15]  }
  0x44   :  { %v869_v29 = vsel %vm868_vm0, %v867_v28, %v864_v27 }
  0x45   :  { %872 = vst.msk [vmem:[#allocation0 + $0x30] sm:$0x3f] %vm816_vm2, %v869_v29  }
  0x90   :  { %v1096_v23 = vpop.permute.xlu1 %1095 }
  0x91   :  { %v1098_v25 = vunpack.i.h.bf16 %v1096_v23  ;;  %v1097_v26 = vunpack.i.l.bf16 %v1096_v23 }
  0x93   :  { %957 = vst.msk [vmem:[#allocation0 + $0x1a] sm:$0x3f] %vm881_vm4, %v1098_v25  }
  0x94   :  { %926 = vst.msk [vmem:[#allocation0 + $0x10] sm:$0xff] %vm881_vm4, %v1097_v26  }
  0x9b   :  { %v973_v44 = vld [vmem:[#allocation0 + $0x10] sm:$0xff] }
  0x9e   :  { %v1086_v30 = vpop.permute.xlu0 %1085 }
  0x9f   :  { %v1088_v31 = vunpack.i.h.bf16 %v1086_v30  ;;  %v1087_v32 = vunpack.i.l.bf16 %v1086_v30 }
  0xa1   :  { %882 = vst.msk [vmem:[#allocation0] sm:$0xff] %vm881_vm4, %v1087_v32  }
  0xa2   :  { %893 = vst.msk [vmem:[#allocation0 + $0x20] sm:$0xff] %vm881_vm4, %v1088_v31  }
  0xa8   :  { %v960_v37 = vld [vmem:[#allocation0] sm:$0xff] }
  0xa9   :  { %v987_v39 = vld [vmem:[#allocation0 + $0x20] sm:$0xff] }
  0xae   :  { %v1091_v33 = vpop.permute.xlu0 %1090 }
  0xaf   :  { %v1093_v34 = vunpack.i.h.bf16 %v1091_v33  ;;  %v1092_v35 = vunpack.i.l.bf16 %v1091_v33 }
  0xb1   :  { %904 = vst.msk [vmem:[#allocation0 + $0x8] sm:$0xff] %vm881_vm4, %v1092_v35  }
  0xb2   :  { %915 = vst.msk [vmem:[#allocation0 + $0x28] sm:$0xff] %vm881_vm4, %v1093_v34  }
  0xb4   :  { %v940_v36 = vpop.permute.xlu1 %939  }
  0xb5   :  { %943 = vst.msk [vmem:[#allocation0 + $0x30] sm:$0x3f] %vm881_vm4, %v940_v36  }
  0xb6   :  { %945 = vst.msk [vmem:[#allocation0 + $0x12] sm:$0xc0] %vm881_vm4, %v940_v36  }
  0xb8   :  { %v966_v38 = vld [vmem:[#allocation0 + $0x8] sm:$0xff] }
  0xb9   :  { %v1069_v40 = vpack.c.bf16 %v966_v38, %v960_v37  ;;  %v994_v41 = vld [vmem:[#allocation0 + $0x28] sm:$0xff] }
  0xba   :  { %v1079_v42 = vpack.c.bf16 %v994_v41, %v987_v39 }
  0xbb   :  { %1070 = vst [vmem:[%s1318_s1] sm:$0xff] %v1069_v40  }
  0xbc   :  { %1082 = vst [vmem:[%s1318_s1 + $0x10] sm:$0xff] %v1079_v42   ;;  %v1001_v43 = vld [vmem:[#allocation0 + $0x30] sm:$0xff] }
  0xbd   :  { %v980_v45 = vld [vmem:[#allocation0 + $0x18] sm:$0xff]  ;;  %v1002_v46 = vpack.c.bf16 0.0, %v1001_v43 }
  0xbe   :  { %v1074_v47 = vpack.c.bf16 %v980_v45, %v973_v44 }
  0xbf   :  { %1065 = vst [vmem:[%s1318_s1 + $0x18] sm:$0xf] %v1002_v46 }
  0xc0   :  { %1081 = vst [vmem:[%s1318_s1 + $0x8] sm:$0xff] %v1074_v47  }

// kernel: discriminator_2d_forward.1
= control target key start
LH: loop header
LB: loop body
LE: loop exit
PB: predicated region body
PF: predicated region fallthrough
CT: control target
= control target key end

     0   :  { %vm64_vm0 = vcmask 1043456   ;;  %s2083_s28 = smov 54   ;;  %s2084_s29 = smov 34   ;;  %vm121_vm1 = vcmask 441344   ;;  %vm124_vm2 = vcmask 883712   ;;  %vm128_vm3 = vcmask 277504   ;;  %s2659_s1 = inlined_call_operand.vmem [shape: bf16[18,54], index: 1, kind: input, shape index: {}]   ;;  %s2660_s0 = inlined_call_operand.vmem [shape: bf16[18,54], index: 0, kind: input, shape index: {}]   ;;  %s2661_s2 = inlined_call_operand.vmem [shape: bf16[216,64], index: 2, kind: input, shape index: {}]   ;;  %s2662_s3 = inlined_call_operand.vmem [shape: f32[1,8], index: 3, kind: input, shape index: {}]   ;;  %s2663_s4 = inlined_call_operand.vmem [shape: bf16[320,64], index: 4, kind: input, shape index: {}]   ;;  %s2664_s5 = inlined_call_operand.vmem [shape: f32[1,16], index: 5, kind: input, shape index: {}]   ;;  %s2665_s6 = inlined_call_operand.vmem [shape: f32[1,16], index: 6, kind: input, shape index: {}]   ;;  %s2666_s7 = inlined_call_operand.vmem [shape: bf16[384,64], index: 7, kind: input, shape index: {}]   ;;  %s2667_s8 = inlined_call_operand.vmem [shape: f32[1,32], index: 8, kind: input, shape index: {}]   ;;  %s2668_s9 = inlined_call_operand.vmem [shape: f32[1,32], index: 9, kind: input, shape index: {}]   ;;  %s2669_s10 = inlined_call_operand.vmem [shape: bf16[512,64], index: 10, kind: input, shape index: {}]   ;;  %s2670_s11 = inlined_call_operand.vmem [shape: f32[1,64], index: 11, kind: input, shape index: {}]   ;;  %s2671_s12 = inlined_call_operand.vmem [shape: f32[1,64], index: 12, kind: input, shape index: {}]   ;;  %s2672_s13 = inlined_call_operand.vmem [shape: f32[2,1], index: 13, kind: output, shape index: {}]  }
   0x1   :  { %v48_v0 = vld [vmem:[%s2659_s1] sm:$0xf]  ;;  %v49_v1 = vld [vmem:[%s2659_s1 + $0x4] sm:$0xf]  ;;  %v50_v2 = vld [vmem:[%s2659_s1 + $0x8] sm:$0x1] }
   0x2   :  { %v70_v3 = vunpack.c.l.b16 %v49_v1  ;;  %v71_v4 = vunpack.c.l.b16 %v50_v2  ;;  %v99_v5 = vunpack.c.l.b16 %v48_v0  ;;  %v2183_v6 = vld [vmem:[%s2660_s0] sm:$0xf]  ;;  %v46_v7 = vld [vmem:[%s2660_s0 + $0x4] sm:$0xf]  ;;  %v47_v8 = vld [vmem:[%s2660_s0 + $0x8] sm:$0x1] }
   0x3   :  { %v53_v9 = vunpack.c.l.b16 %v46_v7  ;;  %v85_v10 = vunpack.c.l.b16 %v2183_v6  ;;  %v1966_v11 = vld [vmem:[%s2661_s2 + $0x38] sm:$0xff]  ;;  %v157_v14 = vld [vmem:[%s2661_s2 + $0x68] sm:$0xf]  ;;  %v54_v15 = vunpack.c.l.b16 %v47_v8  ;;  %v1965_v17 = vld [vmem:[%s2661_s2 + $0x30] sm:$0xff]  ;;  %s2085_s20 = smov 108   ;;  %s2088_s17 = smov 16  }
   0x4   :  { %v72_v12 = vpack.c.b16 %v71_v4, %v70_v3  ;;  %v100_v13 = vpack.c.b16 %v70_v3, %v99_v5  ;;  %284 = vmatpush.bf16.msra.mxu0 %v1966_v11  ;;  %v250_v18 = vunpack.c.l.b16 %v157_v14  ;;  %v1964_v34 = vld [vmem:[%s2661_s2 + $0x28] sm:$0xff]  ;;  %v1971_v36 = vld [vmem:[%s2661_s2 + $0x60] sm:$0xff]  ;;  %v1970_v42 = vld [vmem:[%s2661_s2 + $0x58] sm:$0xff]  ;;  %s2089_s18 = smov 40   ;;  %s2090_s19 = smov 56   ;;  %vm278_vm4 = vcmask 719872  }
   0x5   :  { %v86_v16 = vpack.c.b16 %v53_v9, %v85_v10  ;;  %v55_v29 = vpack.c.b16 %v54_v15, %v53_v9  ;;  %v1963_v41 = vld [vmem:[%s2661_s2 + $0x20] sm:$0xff]  ;;  %v1962_v44 = vld [vmem:[%s2661_s2 + $0x18] sm:$0xff]  ;;  %v1969_v45 = vld [vmem:[%s2661_s2 + $0x50] sm:$0xff]  ;;  %s2091_s1 = smov 24   ;;  %vm182_vm5 = vcmask 64512   ;;  %vm184_vm6 = vcmask 130048  }
   0x6   :  { %v74_v19 = vshrl.u32 %v72_v12, 16  ;;  %v77_v20 = vshll.u32 %v72_v12, 16  ;;  %v102_v21 = vshrl.u32 %v100_v13, 16  ;;  %v104_v22 = vshll.u32 %v100_v13, 16  ;;  %v1961_v46 = vld [vmem:[%s2661_s2 + $0x10] sm:$0xff]  ;;  %v1960_v48 = vld [vmem:[%s2661_s2 + $0x8] sm:$0xff] }
   0x7   :  { %v108_v23 = vrot.slane %v72_v12, 5  ;;  %v90_v24 = vshll.u32 %v86_v16, 16  ;;  %v264_v28 = vpack.c.b16 %v250_v18, %v250_v18  ;;  %v88_v30 = vshrl.u32 %v86_v16, 16  ;;  %v2066_v47 = vld [vmem:[%s2662_s3] ss:$0 sm:$0xff]  ;;  %v1968_v49 = vld [vmem:[%s2661_s2 + $0x48] sm:$0xff] }
   0x8   :  { %v76_v25 = vrot.slane %v74_v19, 4  ;;  %v79_v26 = vrot.slane %v77_v20, 5  ;;  %v106_v27 = vrot.slane %v104_v22, 1  ;;  %285 = vmatpush.bf16.msra.mxu0 %v1965_v17  ;;  %v94_v40 = vrot.slane %v55_v29, 5  ;;  %v1959_v50 = vld [vmem:[%s2661_s2] sm:$0xff]  ;;  %164 = vrot.lane.b32.xlu2 %v2066_v47, %s2088_s17  ;;  %s2093_s14 = smov 112  }
   0x9   :  { %v92_v33 = vrot.slane %v90_v24, 1  ;;  %v282_v35 = vsel %vm64_vm0, %v264_v28, 0  ;;  %v1967_v51 = vld [vmem:[%s2661_s2 + $0x40] sm:$0xff]  ;;  %v57_v52 = vshrl.u32 %v55_v29, 16  ;;  %v60_v53 = vshll.u32 %v55_v29, 16  ;;  %s2094_s15 = smov 80  }
   0xa   :  { %v80_v31 = vor.u32 %v79_v26, %v76_v25  ;;  %v107_v32 = vor.u32 %v106_v27, %v102_v21  ;;  %300 = vmatpush.bf16.msra.mxu1 %v282_v35  ;;  %v158_v1 = vld [vmem:[%s2662_s3] sm:$0x1]  ;;  %vm186_vm7 = vcmask 195584   ;;  %vm188_vm8 = vcmask 261120  }
   0xb   :  { %v93_v39 = vor.u32 %v92_v33, %v88_v30  ;;  %v59_v54 = vrot.slane %v57_v52, 4  ;;  %v62_v55 = vrot.slane %v60_v53, 5  ;;  %vm190_vm9 = vcmask 326656  }
   0xc   :  { %v83_v37 = vsel %vm64_vm0, %v48_v0, %v80_v31  ;;  %v111_v38 = vsel %vm64_vm0, %v107_v32, %v108_v23  ;;  %286 = vmatpush.bf16.msra.mxu0 %v1964_v34  ;;  %vm192_vm10 = vcmask 392192   ;;  %vm194_vm11 = vcmask 457728  }
   0xd   :  { %113 = vrot.lane.b32.xlu0 %v83_v37, %s2083_s28  ;;  %119 = vrot.lane.b32.xlu1 %v111_v38, %s2084_s29  ;;  %v97_v43 = vsel %vm64_vm0, %v93_v39, %v94_v40  ;;  %s2086_s28 = smov 8   ;;  %s2087_s29 = smov 32   ;;  %v63_v57 = vor.u32 %v62_v55, %v59_v54  ;;  %vm341_vm13 = vcmask 1040384   ;;  %vm342_vm14 = vsmask.f32 256  ;;  %v2040_v39 = vld [vmem:[%s2669_s10 + $0xc0] sm:$0xff] }
   0xe   :  { %301 = vmatpush.bf16.msra.mxu1 %v1971_v36  ;;  %vm2255_vm15 = vmand %vm341_vm13, %vm342_vm14  ;;  %vm376_vm14 = vcmask 1044480  }
   0xf   :  { %v67_v58 = vsel %vm64_vm0, %v2183_v6, %v63_v57 }
  0x10   :  { %287 = vmatpush.bf16.msra.mxu0 %v1963_v41  ;;  %167 = vrot.lane.b32.xlu2 %v2066_v47, %s2091_s1 }
  0x12   :  { %302 = vmatpush.bf16.msra.mxu1 %v1970_v42 }
  0x14   :  { %288 = vmatpush.bf16.msra.mxu0 %v1962_v44 }
  0x15   :  { %116 = vrot.lane.b32.xlu0 %v97_v43, %s2085_s20  ;;  %161 = vrot.lane.b32.xlu1 %v2066_v47, %s2086_s28  ;;  %s2092_s20 = smov 48  }
  0x16   :  { %303 = vmatpush.bf16.msra.mxu1 %v1969_v45 }
  0x18   :  { %289 = vmatpush.bf16.msra.mxu0 %v1961_v46  ;;  %176 = vrot.lane.b32.xlu2 %v2066_v47, %s2092_s20 }
  0x1a   :  { %304 = vmatpush.bf16.msra.mxu1 %v1968_v49  ;;  %v2015_v49 = vld [vmem:[%s2666_s7 + $0xb8] sm:$0xff] }
  0x1c   :  { %290 = vmatpush.bf16.msra.mxu0 %v1960_v48 }
  0x1d   :  { %170 = vrot.lane.b32.xlu0 %v2066_v47, %s2087_s29  ;;  %173 = vrot.lane.b32.xlu1 %v2066_v47, %s2089_s18  ;;  %s2097_s18 = smov 64  }
  0x1e   :  { %305 = vmatpush.bf16.msra.mxu1 %v1967_v51 }
  0x20   :  { %291 = vmatpush.bf16.msra.mxu0 %v1959_v50 }
  0x25   :  { %179 = vrot.lane.b32.xlu0 %v2066_v47, %s2090_s19 }
  0x62   :  { %v165_v0 = vpop.permute.xlu2 %164 }
  0x6a   :  { %v168_v4 = vpop.permute.xlu2 %167 }
  0x72   :  { %v177_v11 = vpop.permute.xlu2 %176 }
  0x7f   :  { %v114_v56 = vpop.permute.xlu0 %113  ;;  %v120_v59 = vpop.permute.xlu1 %119 }
  0x80   :  { %v123_v60 = vsel %vm121_vm1, %v67_v58, %v114_v56 }
  0x87   :  { %v117_v61 = vpop.permute.xlu0 %116  ;;  %v162_v2 = vpop.permute.xlu1 %161 }
  0x88   :  { %v126_v62 = vsel %vm124_vm2, %v123_v60, %v117_v61  ;;  %v130_v63 = vsel %vm128_vm3, %v117_v61, %v120_v59  ;;  %v183_v3 = vsel %vm182_vm5, %v158_v1, %v162_v2  ;;  %vm350_vm2 = vcmask 1041408  }
  0x89   :  { %292 = vmatmul.bf16.vlgmr.msra.gmra.mxu0 %v126_v62  ;;  %1653 = vmatmul.msk.bf16.vlgmr.msra.gmra.mxu1 %vm278_vm4, %v130_v63  ;;  %v185_v5 = vsel %vm184_vm6, %v183_v3, %v165_v0  ;;  %vm351_vm3 = vsmask.f32 1280 }
  0x8a   :  { %v187_v7 = vsel %vm186_vm7, %v185_v5, %v168_v4  ;;  %vm2263_vm4 = vmand %vm350_vm2, %vm351_vm3  ;;  %vm359_vm7 = vcmask 1042432  }
  0x8f   :  { %v171_v6 = vpop.permute.xlu0 %170  ;;  %v174_v9 = vpop.permute.xlu1 %173 }
  0x90   :  { %v189_v8 = vsel %vm188_vm8, %v187_v7, %v171_v6 }
  0x91   :  { %v191_v10 = vsel %vm190_vm9, %v189_v8, %v174_v9  ;;  %vm360_vm9 = vsmask.f32 2304  ;;  %v1991_v8 = vld [vmem:[%s2663_s4 + $0x98] sm:$0xff] }
  0x92   :  { %v193_v12 = vsel %vm192_vm10, %v191_v10, %v177_v11  ;;  %v1979_v10 = vld [vmem:[%s2663_s4 + $0x38] sm:$0xff]  ;;  %662 = vmatpush.bf16.msrb.mxu1 %v1991_v8 }
  0x93   :  { %632 = vmatpush.bf16.msra.mxu2 %v1979_v10 }
  0x97   :  { %v180_v13 = vpop.permute.xlu0 %179 }
  0x98   :  { %v195_v14 = vsel %vm194_vm11, %v193_v12, %v180_v13  ;;  %vm369_vm11 = vsmask.f32 3328  ;;  %v1990_v12 = vld [vmem:[%s2663_s4 + $0x90] sm:$0xff] }
  0x99   :  { %v196_v15 = vperm.slane %v195_v14, 0  ;;  %vm2281_vm3 = vmand %vm64_vm0, %vm369_vm11  ;;  %vm418_vm11 = vcmask 588800   ;;  %v1978_v13 = vld [vmem:[%s2663_s4 + $0x30] sm:$0xff]  ;;  %663 = vmatpush.bf16.msrb.mxu1 %v1990_v12 }
  0x9a   :  { %633 = vmatpush.bf16.msra.mxu2 %v1978_v13 }
 0x106   :  { %v293_v16 = vpop.f32.mrf.mxu0  ;;  %v307_v17 = vpop.f32.mrf.mxu1 }
 0x107   :  { %v294_v18 = vadd.f32 %v293_v16, %v196_v15 }
 0x109   :  { %v308_v19 = vadd.f32 %v307_v17, %v294_v18  ;;  %v1989_v18 = vld [vmem:[%s2663_s4 + $0x88] sm:$0xff] }
 0x10a   :  { %664 = vmatpush.bf16.msrb.mxu1 %v1989_v18 }
 0x10b   :  { %vm312_vm12 = vcmp.ge.f32.partialorder %v308_v19, 0.0  ;;  %v314_v20 = vmul.f32 0.01, %v308_v19 }
 0x10d   :  { %v316_v21 = vsel %vm312_vm12, %v308_v19, %v314_v20  ;;  %vm2274_vm12 = vmand %vm359_vm7, %vm360_vm9 }
 0x10e   :  { %v318_v22 = vpack.c.bf16 %v316_v21, %v316_v21  ;;  %v295_v23 = vpop.f32.mrf.mxu0  ;;  %v309_v26 = vpop.f32.mrf.mxu1  ;;  %v1988_v21 = vld [vmem:[%s2663_s4 + $0x80] sm:$0xff] }
 0x10f   :  { %v296_v24 = vadd.f32 %v295_v23, %v196_v15  ;;  %665 = vmatpush.bf16.msrb.mxu1 %v1988_v21 }
 0x110   :  { %v321_v25 = vunpack.c.l.b16 %v318_v22  ;;  %v344_v34 = vsel %vm2255_vm15, 0, %v318_v22 }
 0x111   :  { %v310_v27 = vadd.f32 %v309_v26, %v296_v24 }
 0x112   :  { %v322_v28 = vpack.c.b16 %v321_v25, %v321_v25 }
 0x113   :  { %vm313_vm1 = vcmp.ge.f32.partialorder %v310_v27, 0.0  ;;  %v315_v30 = vmul.f32 0.01, %v310_v27 }
 0x114   :  { %v324_v31 = vshrl.u32 %v322_v28, 16  ;;  %v380_v32 = vshll.u32 %v322_v28, 16  ;;  %v326_v33 = vrot.slane %v322_v28, 1 }
 0x115   :  { %v317_v35 = vsel %vm313_vm1, %v310_v27, %v315_v30  ;;  %vm377_vm1 = vsmask.f32 4352 }
 0x116   :  { %v348_v36 = vsel %vm341_vm13, %v344_v34, %v324_v31  ;;  %v382_v37 = vrot.slane %v380_v32, 1  ;;  %v319_v38 = vpack.c.bf16 %v317_v35, %v317_v35  ;;  %v328_v42 = vrot.slane %v324_v31, 1  ;;  %vm378_vm9 = vmand %vm376_vm14, %vm377_vm1  ;;  %v1987_v34 = vld [vmem:[%s2663_s4 + $0x78] sm:$0xff]  ;;  %v1976_v35 = vld [vmem:[%s2663_s4 + $0x20] sm:$0xff] }
 0x117   :  { %v353_v44 = vsel %vm2263_vm4, %v348_v36, %v326_v33  ;;  %v384_v45 = vrot.slane %v380_v32, 2  ;;  %645 = vmatpush.bf16.msra.mxu3 %v1987_v34  ;;  %v1986_v36 = vld [vmem:[%s2663_s4 + $0x70] sm:$0xff] }
 0x118   :  { %v392_v40 = vsel %vm2255_vm15, %v318_v22, %v382_v37  ;;  %v330_v41 = vunpack.c.l.b16 %v319_v38  ;;  %v357_v48 = vsel %vm350_vm2, %v353_v44, %v328_v42  ;;  %v1975_v37 = vld [vmem:[%s2663_s4 + $0x18] sm:$0xff]  ;;  %v1974_v38 = vld [vmem:[%s2663_s4 + $0x10] sm:$0xff]  ;;  %v1985_v42 = vld [vmem:[%s2663_s4 + $0x68] sm:$0xff] }
 0x119   :  { %v395_v43 = vsel %vm341_vm13, %v392_v40, %v326_v33  ;;  %v362_v56 = vsel %vm2274_vm12, %v357_v48, 0  ;;  %v1977_v33 = vld [vmem:[%s2663_s4 + $0x28] sm:$0xff]  ;;  %v1980_v48 = vld [vmem:[%s2663_s4 + $0x40] sm:$0xff] }
 0x11a   :  { %v331_v46 = vpack.c.b16 %v330_v41, %v330_v41  ;;  %v397_v51 = vsel %vm2263_vm4, %v395_v43, %v384_v45  ;;  %634 = vmatpush.bf16.msra.mxu2 %v1977_v33  ;;  %v1973_v40 = vld [vmem:[%s2663_s4 + $0x8] sm:$0xff]  ;;  %v1972_v41 = vld [vmem:[%s2663_s4] sm:$0xff]  ;;  %v1983_v45 = vld [vmem:[%s2663_s4 + $0x58] sm:$0xff] }
 0x11b   :  { %v400_v57 = vsel %vm350_vm2, %v397_v51, 0  ;;  %646 = vmatpush.bf16.msra.mxu3 %v1986_v36  ;;  %v1984_v43 = vld [vmem:[%s2663_s4 + $0x60] sm:$0xff] }
 0x11c   :  { %v333_v47 = vshrl.u32 %v331_v46, 16  ;;  %v386_v50 = vshll.u32 %v331_v46, 16  ;;  %v336_v55 = vrot.slane %v331_v46, 6  ;;  %v339_v62 = vrot.slane %v331_v46, 7  ;;  %v1982_v46 = vld [vmem:[%s2663_s4 + $0x50] sm:$0xff] }
 0x11e   :  { %v335_v52 = vrot.slane %v333_v47, 5  ;;  %v388_v54 = vrot.slane %v386_v50, 6  ;;  %v338_v58 = vrot.slane %v333_v47, 6  ;;  %v390_v60 = vrot.slane %v386_v50, 7  ;;  %635 = vmatpush.bf16.msra.mxu2 %v1976_v35  ;;  %v1981_v47 = vld [vmem:[%s2663_s4 + $0x48] sm:$0xff]  ;;  %s2095_s4 = smov 96  }
 0x11f   :  { %647 = vmatpush.bf16.msra.mxu3 %v1985_v42 }
 0x120   :  { %v366_v59 = vsel %vm359_vm7, %v362_v56, %v335_v52  ;;  %v402_v61 = vsel %vm2274_vm12, %v400_v57, %v388_v54 }
 0x121   :  { %v371_v63 = vsel %vm2281_vm3, %v366_v59, %v336_v55  ;;  %v405_v0 = vsel %vm359_vm7, %v402_v61, %v336_v55  ;;  %vm465_vm7 = vcmask 916480  }
 0x122   :  { %v374_v1 = vsel %vm64_vm0, %v371_v63, %v338_v58  ;;  %v407_v2 = vsel %vm2281_vm3, %v405_v0, %v390_v60  ;;  %636 = vmatpush.bf16.msra.mxu2 %v1975_v37 }
 0x123   :  { %v379_v3 = vsel %vm378_vm9, %v374_v1, %v339_v62  ;;  %v410_v4 = vsel %vm64_vm0, %v407_v2, %v339_v62  ;;  %vm629_vm0 = vcmask 523264   ;;  %648 = vmatpush.bf16.msra.mxu3 %v1984_v43 }
 0x124   :  { %414 = vrot.lane.b32.xlu1 %v379_v3, %s2086_s28  ;;  %v412_v5 = vsel %vm378_vm9, %v410_v4, 0 }
 0x125   :  { %421 = vrot.lane.b32.xlu2 %v412_v5, %s2086_s28 }
 0x126   :  { %637 = vmatpush.bf16.msra.mxu2 %v1974_v38 }
 0x127   :  { %649 = vmatpush.bf16.msra.mxu3 %v1983_v45 }
 0x12a   :  { %638 = vmatpush.bf16.msra.mxu2 %v1973_v40 }
 0x12b   :  { %650 = vmatpush.bf16.msra.mxu3 %v1982_v46  ;;  %v671_v46 = vld [vmem:[%s2664_s5] sm:$0x1] }
 0x12e   :  { %639 = vmatpush.bf16.msra.mxu2 %v1972_v41 }
 0x12f   :  { %651 = vmatpush.bf16.msra.mxu3 %v1981_v47 }
 0x133   :  { %652 = vmatpush.bf16.msra.mxu3 %v1980_v48 }
 0x137   :  { %1081 = vmatpush.bf16.msrb.mxu3 %v2015_v49 }
 0x17f   :  { %v422_v6 = vpop.permute.xlu2 %421 }
 0x180   :  { %v424_v7 = vsel %vm182_vm5, 0, %v422_v6 }
 0x181   :  { %v425_v9 = vsel %vm418_vm11, %v424_v7, 0 }
 0x182   :  { %v436_v11 = vshll.u32 %v425_v9, 16  ;;  %v434_v14 = vshrl.u32 %v425_v9, 16  ;;  %v447_v16 = vrot.slane %v425_v9, 1 }
 0x184   :  { %v438_v15 = vrot.slane %v436_v11, 1 }
 0x186   :  { %v439_v17 = vor.u32 %v438_v15, %v434_v14  ;;  %v2096_v14 = vmov 32.0  }
 0x187   :  { %2067 = vrcp.f32 %v2096_v14 }
 0x188   :  { %v449_v19 = vsel %vm350_vm2, %v439_v17, %v447_v16  ;;  %v441_v20 = vsel %vm350_vm2, %v425_v9, %v439_v17 }
 0x189   :  { %457 = vrot.lane.b32.xlu2 %v449_v19, %s2093_s14  ;;  %451 = vrot.lane.b32.xlu0 %v441_v20, %s2094_s15 }
 0x18d   :  { %v2068_v15 = vpop.eup %2067 }
 0x18e   :  { %v702_v16 = vmul.f32 32.0, %v2068_v15  ;;  %vm706_vm14 = vweird.f32 %v2068_v15 }
 0x190   :  { %v703_v17 = vsub.f32 1.0, %v702_v16 }
 0x192   :  { %v704_v21 = vmul.f32 %v2068_v15, %v703_v17 }
 0x196   :  { %v415_v22 = vpop.permute.xlu1 %414 }
 0x197   :  { %v417_v23 = vsel %vm182_vm5, 0, %v415_v22  ;;  %vm459_vm5 = vcmask 654336  }
 0x198   :  { %v419_v24 = vsel %vm418_vm11, %v417_v23, 0  ;;  %v705_v23 = vadd.f32 %v2068_v15, %v704_v21 }
 0x199   :  { %v428_v25 = vshll.u32 %v419_v24, 16  ;;  %v426_v26 = vshrl.u32 %v419_v24, 16  ;;  %v443_v28 = vrot.slane %v419_v24, 1 }
 0x19b   :  { %v430_v27 = vrot.slane %v428_v25, 1 }
 0x19d   :  { %v431_v30 = vor.u32 %v430_v27, %v426_v26  ;;  %v707_v27 = vsel %vm706_vm14, %v2068_v15, %v705_v23 }
 0x19f   :  { %v445_v31 = vsel %vm350_vm2, %v431_v30, %v443_v28  ;;  %v433_v32 = vsel %vm350_vm2, %v419_v24, %v431_v30 }
 0x1a0   :  { %454 = vrot.lane.b32.xlu1 %v445_v31, %s2087_s29 }
 0x1e3   :  { %v458_v44 = vpop.permute.xlu2 %457 }
 0x1e4   :  { %1734 = vmatmul.msk.bf16.vlgmr.msrb.gmra.mxu1 %vm629_vm0, %v458_v44 }
 0x1fb   :  { %v452_v50 = vpop.permute.xlu0 %451 }
 0x1fc   :  { %v461_v51 = vsel %vm459_vm5, %v433_v32, %v452_v50 }
 0x1fd   :  { %640 = vmatmul.bf16.vlgmr.msra.gmra.mxu2 %v461_v51 }
 0x212   :  { %v455_v52 = vpop.permute.xlu1 %454 }
 0x213   :  { %v464_v53 = vsel %vm188_vm8, %v452_v50, %v455_v52 }
 0x214   :  { %v467_v54 = vsel %vm465_vm7, %v464_v53, %v458_v44  ;;  %v672_v53 = vld [vmem:[%s2665_s6] sm:$0x1] }
 0x215   :  { %653 = vmatmul.bf16.vlgmr.msra.gmra.mxu3 %v467_v54 }
 0x261   :  { %v667_v55 = vpop.f32.mrf.mxu1 }
 0x269   :  { %v669_v56 = vpop.f32.mrf.mxu1 }
 0x280   :  { %v641_v57 = vpop.f32.mrf.mxu2 }
 0x288   :  { %v643_v58 = vpop.f32.mrf.mxu2 }
 0x298   :  { %v654_v59 = vpop.f32.mrf.mxu3 }
 0x299   :  { %v655_v60 = vadd.f32 %v654_v59, %v641_v57 }
 0x29b   :  { %v2374_v61 = vadd.f32 %v667_v55, %v655_v60 }
 0x29d   :  { %v673_v62 = vsel %vm629_vm0, %v2374_v61, 0.0  ;;  %v680_v63 = vmul.f32 %v2374_v61, %v2374_v61 }
 0x29e   :  { %v674_v0 = vrot.slane %v673_v62, 4 }
 0x29f   :  { %v681_v1 = vsel %vm629_vm0, %v680_v63, 0.0 }
 0x2a0   :  { %v675_v2 = vadd.f32 %v674_v0, %v673_v62  ;;  %v682_v3 = vrot.slane %v681_v1, 4  ;;  %v656_v4 = vpop.f32.mrf.mxu3 }
 0x2a2   :  { %v676_v5 = vrot.slane %v675_v2, 2  ;;  %v683_v6 = vadd.f32 %v682_v3, %v681_v1 }
 0x2a4   :  { %v677_v7 = vadd.f32 %v676_v5, %v675_v2  ;;  %v684_v8 = vrot.slane %v683_v6, 2 }
 0x2a6   :  { %v678_v9 = vrot.slane %v677_v7, 1  ;;  %v685_v10 = vadd.f32 %v684_v8, %v683_v6 }
 0x2a8   :  { %v679_v11 = vadd.f32 %v678_v9, %v677_v7  ;;  %v686_v12 = vrot.slane %v685_v10, 1 }
 0x2aa   :  { %693 = vrot.lane.b32.xlu1 %v679_v11, %s2095_s4  ;;  %689 = vrot.lane.b32.xlu0 %v679_v11, %s2093_s14  ;;  %v687_v13 = vadd.f32 %v686_v12, %v685_v10 }
 0x2ac   :  { %710 = vrot.lane.b32.xlu2 %v687_v13, %s2093_s14 }
 0x2b2   :  { %714 = vrot.lane.b32.xlu1 %v687_v13, %s2095_s4  ;;  %697 = vrot.lane.b32.xlu0 %v679_v11, %s2094_s15 }
 0x2b4   :  { %718 = vrot.lane.b32.xlu2 %v687_v13, %s2094_s15 }
 0x306   :  { %v711_v18 = vpop.permute.xlu2 %710 }
 0x307   :  { %v713_v24 = vadd.f32 %v711_v18, %v687_v13 }
 0x30e   :  { %v719_v32 = vpop.permute.xlu2 %718 }
 0x31c   :  { %v694_v19 = vpop.permute.xlu1 %693  ;;  %v690_v20 = vpop.permute.xlu0 %689 }
 0x31d   :  { %v692_v22 = vadd.f32 %v690_v20, %v679_v11 }
 0x31f   :  { %v696_v25 = vadd.f32 %v694_v19, %v692_v22 }
 0x324   :  { %v715_v26 = vpop.permute.xlu1 %714  ;;  %v698_v28 = vpop.permute.xlu0 %697 }
 0x325   :  { %v717_v30 = vadd.f32 %v715_v26, %v713_v24  ;;  %v700_v31 = vadd.f32 %v698_v28, %v696_v25  ;;  %v1998_v28 = vld [vmem:[%s2666_s7 + $0x30] sm:$0xff] }
 0x327   :  { %v721_v33 = vadd.f32 %v719_v32, %v717_v30  ;;  %v708_v34 = vmul.f32 %v707_v27, %v700_v31  ;;  %v2007_v30 = vld [vmem:[%s2666_s7 + $0x78] sm:$0xff]  ;;  %v2006_v31 = vld [vmem:[%s2666_s7 + $0x70] sm:$0xff] }
 0x328   :  { %1068 = vmatpush.bf16.msrb.mxu2 %v2007_v30  ;;  %v2014_v32 = vld [vmem:[%s2666_s7 + $0xb0] sm:$0xff] }
 0x329   :  { %v722_v35 = vmul.f32 %v721_v33, %v707_v27  ;;  %v723_v36 = vmul.f32 %v708_v34, %v708_v34  ;;  %v1999_v27 = vld [vmem:[%s2666_s7 + $0x38] sm:$0xff]  ;;  %v1997_v33 = vld [vmem:[%s2666_s7 + $0x28] sm:$0xff]  ;;  %1082 = vmatpush.bf16.msrb.mxu3 %v2014_v32 }
 0x32a   :  { %1055 = vmatpush.bf16.msrb.mxu0 %v1999_v27 }
 0x32b   :  { %v724_v37 = vsub.f32 %v722_v35, %v723_v36  ;;  %v1996_v35 = vld [vmem:[%s2666_s7 + $0x20] sm:$0xff]  ;;  %v1995_v36 = vld [vmem:[%s2666_s7 + $0x18] sm:$0xff] }
 0x32c   :  { %1069 = vmatpush.bf16.msrb.mxu2 %v2006_v31 }
 0x32d   :  { %v725_v38 = vmax.f32 %v724_v37, 0.0  ;;  %v1994_v37 = vld [vmem:[%s2666_s7 + $0x10] sm:$0xff] }
 0x32e   :  { %1056 = vmatpush.bf16.msrb.mxu0 %v1998_v28 }
 0x32f   :  { %v726_v40 = vadd.f32 1e-05, %v725_v38 }
 0x331   :  { %2069 = vrsqrt.f32 %v726_v40  ;;  %vm733_vm3 = vweird.f32 %v726_v40 }
 0x332   :  { %1057 = vmatpush.bf16.msrb.mxu0 %v1997_v33 }
 0x336   :  { %1058 = vmatpush.bf16.msrb.mxu0 %v1996_v35 }
 0x337   :  { %v2070_v41 = vpop.eup %2069 }
 0x338   :  { %v728_v42 = vmul.f32 %v2070_v41, %v726_v40  ;;  %vm734_vm1 = vweird.f32 %v2070_v41 }
 0x339   :  { %vm735_vm9 = vmor %vm733_vm3, %vm734_vm1 }
 0x33a   :  { %v729_v43 = vmul.f32 %v2070_v41, %v728_v42  ;;  %1059 = vmatpush.bf16.msrb.mxu0 %v1995_v36 }
 0x33c   :  { %v730_v44 = vmul.f32 0.5, %v729_v43 }
 0x33e   :  { %v731_v45 = vsub.f32 1.5, %v730_v44  ;;  %1060 = vmatpush.bf16.msrb.mxu0 %v1994_v37  ;;  %v1993_v44 = vld [vmem:[%s2666_s7 + $0x8] sm:$0xff] }
 0x340   :  { %v732_v47 = vmul.f32 %v2070_v41, %v731_v45 }
 0x342   :  { %v736_v48 = vsel %vm735_vm9, %v2070_v41, %v732_v47  ;;  %1061 = vmatpush.bf16.msrb.mxu0 %v1993_v44  ;;  %vm1595_vm9 = vcmask 1024  }
 0x343   :  { %v737_v50 = vmul.f32 %v736_v48, %v671_v46 }
 0x345   :  { %v738_v51 = vmul.f32 %v737_v50, %v708_v34  ;;  %v741_v52 = vperm.slane %v737_v50, 0  ;;  %v2005_v34 = vld [vmem:[%s2666_s7 + $0x68] sm:$0xff] }
 0x346   :  { %1070 = vmatpush.bf16.msrb.mxu2 %v2005_v34 }
 0x347   :  { %748 = vrot.lane.b32.xlu2 %v741_v52, %s2092_s20  ;;  %745 = vrot.lane.b32.xlu1 %v741_v52, %s2087_s29  ;;  %v739_v54 = vsub.f32 %v672_v53, %v738_v51  ;;  %v1992_v53 = vld [vmem:[%s2666_s7] sm:$0xff] }
 0x348   :  { %742 = vrot.lane.b32.xlu0 %v741_v52, %s2088_s17  ;;  %1062 = vmatpush.bf16.msrb.mxu0 %v1992_v53 }
 0x349   :  { %v757_v55 = vperm.slane %v739_v54, 0 }
 0x34f   :  { %764 = vrot.lane.b32.xlu2 %v757_v55, %s2092_s20  ;;  %761 = vrot.lane.b32.xlu1 %v757_v55, %s2087_s29 }
 0x350   :  { %758 = vrot.lane.b32.xlu0 %v757_v55, %s2088_s17 }
 0x3a1   :  { %v749_v57 = vpop.permute.xlu2 %748 }
 0x3a9   :  { %v765_v3 = vpop.permute.xlu2 %764 }
 0x3b9   :  { %v746_v56 = vpop.permute.xlu1 %745 }
 0x3ba   :  { %v743_v58 = vpop.permute.xlu0 %742 }
 0x3bb   :  { %v751_v59 = vsel %vm184_vm6, %v737_v50, %v743_v58 }
 0x3bc   :  { %v752_v60 = vsel %vm188_vm8, %v751_v59, %v746_v56 }
 0x3bd   :  { %v753_v62 = vsel %vm192_vm10, %v752_v60, %v749_v57 }
 0x3be   :  { %v754_v0 = vperm.slane %v753_v62, 0 }
 0x3c0   :  { %v755_v6 = vmul.f32 %v754_v0, %v2374_v61  ;;  %v2004_v0 = vld [vmem:[%s2666_s7 + $0x60] sm:$0xff] }
 0x3c1   :  { %v762_v63 = vpop.permute.xlu1 %761  ;;  %1071 = vmatpush.bf16.msrb.mxu2 %v2004_v0 }
 0x3c2   :  { %v759_v1 = vpop.permute.xlu0 %758 }
 0x3c3   :  { %v767_v2 = vsel %vm184_vm6, %v739_v54, %v759_v1  ;;  %v2012_v1 = vld [vmem:[%s2666_s7 + $0xa0] sm:$0xff] }
 0x3c4   :  { %v768_v4 = vsel %vm188_vm8, %v767_v2, %v762_v63  ;;  %v2013_v63 = vld [vmem:[%s2666_s7 + $0xa8] sm:$0xff]  ;;  %v2003_v2 = vld [vmem:[%s2666_s7 + $0x58] sm:$0xff] }
 0x3c5   :  { %v769_v5 = vsel %vm192_vm10, %v768_v4, %v765_v3  ;;  %1083 = vmatpush.bf16.msrb.mxu3 %v2013_v63  ;;  %v2011_v3 = vld [vmem:[%s2666_s7 + $0x98] sm:$0xff]  ;;  %1072 = vmatpush.bf16.msrb.mxu2 %v2003_v2  ;;  %v2002_v4 = vld [vmem:[%s2666_s7 + $0x50] sm:$0xff]  ;;  %vm1096_vm10 = vcmask 519168   ;;  %v1094_v63 = vld [vmem:[%s2667_s8] sm:$0x1] }
 0x3c6   :  { %v770_v7 = vperm.slane %v769_v5, 0  ;;  %v2010_v5 = vld [vmem:[%s2666_s7 + $0x90] sm:$0xff] }
 0x3c8   :  { %v771_v8 = vadd.f32 %v770_v7, %v755_v6  ;;  %v2001_v6 = vld [vmem:[%s2666_s7 + $0x48] sm:$0xff] }
 0x3c9   :  { %1084 = vmatpush.bf16.msrb.mxu3 %v2012_v1  ;;  %1073 = vmatpush.bf16.msrb.mxu2 %v2002_v4  ;;  %v2009_v7 = vld [vmem:[%s2666_s7 + $0x88] sm:$0xff] }
 0x3ca   :  { %vm772_vm11 = vcmp.ge.f32.partialorder %v771_v8, 0.0  ;;  %v773_v9 = vmul.f32 0.01, %v771_v8 }
 0x3cc   :  { %v774_v10 = vsel %vm772_vm11, %v771_v8, %v773_v9  ;;  %v2000_v8 = vld [vmem:[%s2666_s7 + $0x40] sm:$0xff] }
 0x3cd   :  { %v775_v11 = vpack.c.bf16 %v774_v10, %v774_v10  ;;  %1085 = vmatpush.bf16.msrb.mxu3 %v2011_v3  ;;  %1074 = vmatpush.bf16.msrb.mxu2 %v2001_v6  ;;  %v2008_v9 = vld [vmem:[%s2666_s7 + $0x80] sm:$0xff] }
 0x3ce   :  { %v1095_v3 = vld [vmem:[%s2668_s9] sm:$0x1] }
 0x3cf   :  { %v777_v12 = vunpack.c.l.b16 %v775_v11  ;;  %v784_v16 = vsel %vm2255_vm15, 0, %v775_v11 }
 0x3d1   :  { %v778_v13 = vpack.c.b16 %v777_v12, %v777_v12  ;;  %1086 = vmatpush.bf16.msrb.mxu3 %v2010_v5  ;;  %1075 = vmatpush.bf16.msrb.mxu2 %v2000_v8  ;;  %v2039_v8 = vld [vmem:[%s2669_s10 + $0xb8] sm:$0xff] }
 0x3d3   :  { %v780_v14 = vshrl.u32 %v778_v13, 16  ;;  %v794_v15 = vshll.u32 %v778_v13, 16  ;;  %v782_v19 = vrot.slane %v778_v13, 1 }
 0x3d5   :  { %v787_v17 = vsel %vm341_vm13, %v784_v16, %v780_v14  ;;  %v796_v18 = vrot.slane %v794_v15, 1  ;;  %1087 = vmatpush.bf16.msrb.mxu3 %v2009_v7  ;;  %1499 = vmatpush.bf16.msra.mxu2 %v2039_v8 }
 0x3d6   :  { %v789_v61 = vsel %vm2263_vm4, %v787_v17, 0 }
 0x3d7   :  { %v791_v20 = vsel %vm350_vm2, %v789_v61, %v780_v14  ;;  %v798_v21 = vsel %vm2255_vm15, %v775_v11, %v796_v18 }
 0x3d8   :  { %v793_v22 = vsel %vm2274_vm12, %v791_v20, %v782_v19  ;;  %v800_v23 = vsel %vm341_vm13, %v798_v21, 0 }
 0x3d9   :  { %809 = vrot.lane.b32.xlu0 %v793_v22, %s2088_s17  ;;  %v802_v24 = vsel %vm2263_vm4, %v800_v23, %v796_v18  ;;  %1088 = vmatpush.bf16.msrb.mxu3 %v2008_v9  ;;  %v2047_v9 = vld [vmem:[%s2669_s10 + $0xf8] sm:$0xff] }
 0x3da   :  { %v805_v25 = vsel %vm350_vm2, %v802_v24, %v782_v19 }
 0x3db   :  { %v807_v26 = vsel %vm2274_vm12, %v805_v25, 0 }
 0x3dc   :  { %815 = vrot.lane.b32.xlu1 %v807_v26, %s2088_s17 }
 0x3dd   :  { %1512 = vmatpush.bf16.msra.mxu3 %v2047_v9 }
 0x44b   :  { %v810_v38 = vpop.permute.xlu0 %809 }
 0x44c   :  { %v812_v40 = vsel %vm184_vm6, 0, %v810_v38  ;;  %v2098_v38 = vmov 8.0  }
 0x44d   :  { %v813_v41 = vsel %vm459_vm5, %v812_v40, 0  ;;  %2071 = vrcp.f32 %v2098_v38 }
 0x44e   :  { %v822_v42 = vshll.u32 %v813_v41, 16  ;;  %v816_v43 = vpop.permute.xlu1 %815  ;;  %v820_v46 = vshrl.u32 %v813_v41, 16  ;;  %v837_v51 = vrot.slane %v813_v41, 1 }
 0x44f   :  { %v818_v45 = vsel %vm184_vm6, 0, %v816_v43  ;;  %vm853_vm6 = vcmask 785408  }
 0x450   :  { %v824_v47 = vrot.slane %v822_v42, 1  ;;  %v819_v48 = vsel %vm459_vm5, %v818_v45, 0 }
 0x451   :  { %v830_v50 = vshll.u32 %v819_v48, 16  ;;  %v828_v54 = vshrl.u32 %v819_v48, 16  ;;  %v841_v58 = vrot.slane %v819_v48, 1 }
 0x452   :  { %v825_v52 = vor.u32 %v824_v47, %v820_v46 }
 0x453   :  { %v832_v55 = vrot.slane %v830_v50, 1  ;;  %v2072_v40 = vpop.eup %2071 }
 0x454   :  { %v839_v56 = vsel %vm341_vm13, %v825_v52, %v837_v51  ;;  %v827_v57 = vsel %vm341_vm13, %v813_v41, %v825_v52  ;;  %v1118_v41 = vmul.f32 8.0, %v2072_v40  ;;  %vm1122_vm2 = vweird.f32 %v2072_v40 }
 0x455   :  { %848 = vrot.lane.b32.xlu0 %v839_v56, %s2097_s18  ;;  %v833_v59 = vor.u32 %v832_v55, %v828_v54 }
 0x456   :  { %v1119_v42 = vsub.f32 1.0, %v1118_v41  ;;  %v2033_v41 = vld [vmem:[%s2669_s10 + $0x88] sm:$0xff] }
 0x457   :  { %v843_v60 = vsel %vm341_vm13, %v833_v59, %v841_v58  ;;  %v835_v62 = vsel %vm341_vm13, %v819_v48, %v833_v59 }
 0x458   :  { %851 = vrot.lane.b32.xlu1 %v843_v60, %s2087_s29  ;;  %845 = vrot.lane.b32.xlu2 %v835_v62, %s2095_s4  ;;  %v1120_v43 = vmul.f32 %v2072_v40, %v1119_v42  ;;  %v2041_v42 = vld [vmem:[%s2669_s10 + $0xc8] sm:$0xff] }
 0x45a   :  { %v1121_v44 = vadd.f32 %v2072_v40, %v1120_v43 }
 0x45c   :  { %v1123_v47 = vsel %vm1122_vm2, %v2072_v40, %v1121_v44 }
 0x4b2   :  { %v846_v10 = vpop.permute.xlu2 %845 }
 0x4b3   :  { %v855_v11 = vsel %vm853_vm6, %v827_v57, %v846_v10 }
 0x4b4   :  { %1063 = vmatmul.bf16.vlgmr.msrb.gmra.mxu0 %v855_v11  ;;  %v2031_v11 = vld [vmem:[%s2669_s10 + $0x78] sm:$0xff] }
 0x4b5   :  { %1486 = vmatpush.bf16.msra.mxu0 %v2031_v11 }
 0x4c7   :  { %v849_v12 = vpop.permute.xlu0 %848 }
 0x4c8   :  { %v858_v13 = vsel %vm629_vm0, %v846_v10, %v849_v12  ;;  %v2023_v10 = vld [vmem:[%s2669_s10 + $0x38] sm:$0xff] }
 0x4c9   :  { %1076 = vmatmul.bf16.vlgmr.msrb.gmra.mxu2 %v858_v13  ;;  %v2046_v13 = vld [vmem:[%s2669_s10 + $0xf0] sm:$0xff]  ;;  %1473 = vmatpush.bf16.msra.mxu1 %v2023_v10 }
 0x4ca   :  { %v852_v14 = vpop.permute.xlu1 %851  ;;  %1513 = vmatpush.bf16.msra.mxu3 %v2046_v13 }
 0x4cb   :  { %v861_v15 = vsel %vm188_vm8, %v849_v12, %v852_v14  ;;  %v2038_v12 = vld [vmem:[%s2669_s10 + $0xb0] sm:$0xff] }
 0x4cc   :  { %1089 = vmatmul.bf16.vlgmr.msrb.gmra.mxu3 %v861_v15  ;;  %v2022_v14 = vld [vmem:[%s2669_s10 + $0x30] sm:$0xff]  ;;  %1500 = vmatpush.bf16.msra.mxu2 %v2038_v12  ;;  %v2099_v12 = vmov 2.0  }
 0x4cd   :  { %v2030_v15 = vld [vmem:[%s2669_s10 + $0x70] sm:$0xff]  ;;  %1474 = vmatpush.bf16.msra.mxu1 %v2022_v14 }
 0x4ce   :  { %1487 = vmatpush.bf16.msra.mxu0 %v2030_v15 }
 0x531   :  { %v1064_v16 = vpop.f32.mrf.mxu0 }
 0x539   :  { %v1066_v17 = vpop.f32.mrf.mxu0 }
 0x53a   :  { %v2045_v17 = vld [vmem:[%s2669_s10 + $0xe8] sm:$0xff] }
 0x53b   :  { %1514 = vmatpush.bf16.msra.mxu3 %v2045_v17 }
 0x54c   :  { %v1077_v18 = vpop.f32.mrf.mxu2 }
 0x54d   :  { %v1078_v19 = vadd.f32 %v1077_v18, %v1064_v16  ;;  %v2037_v16 = vld [vmem:[%s2669_s10 + $0xa8] sm:$0xff] }
 0x54e   :  { %v2021_v18 = vld [vmem:[%s2669_s10 + $0x28] sm:$0xff]  ;;  %1501 = vmatpush.bf16.msra.mxu2 %v2037_v16 }
 0x54f   :  { %v1090_v61 = vpop.f32.mrf.mxu3  ;;  %1475 = vmatpush.bf16.msra.mxu1 %v2021_v18 }
 0x550   :  { %v2509_v20 = vadd.f32 %v1090_v61, %v1078_v19  ;;  %v2029_v19 = vld [vmem:[%s2669_s10 + $0x68] sm:$0xff]  ;;  %v2036_v61 = vld [vmem:[%s2669_s10 + $0xa0] sm:$0xff] }
 0x551   :  { %1488 = vmatpush.bf16.msra.mxu0 %v2029_v19 }
 0x552   :  { %v1097_v21 = vsel %vm1096_vm10, %v2509_v20, 0.0  ;;  %v1104_v22 = vmul.f32 %v2509_v20, %v2509_v20  ;;  %1502 = vmatpush.bf16.msra.mxu2 %v2036_v61 }
 0x553   :  { %v1098_v23 = vrot.slane %v1097_v21, 4 }
 0x554   :  { %v1105_v24 = vsel %vm1096_vm10, %v1104_v22, 0.0  ;;  %v1079_v25 = vpop.f32.mrf.mxu2  ;;  %v2020_v22 = vld [vmem:[%s2669_s10 + $0x20] sm:$0xff] }
 0x555   :  { %v1099_v26 = vadd.f32 %v1098_v23, %v1097_v21  ;;  %v1106_v27 = vrot.slane %v1105_v24, 4  ;;  %v2044_v21 = vld [vmem:[%s2669_s10 + $0xe0] sm:$0xff]  ;;  %v2035_v25 = vld [vmem:[%s2669_s10 + $0x98] sm:$0xff]  ;;  %1476 = vmatpush.bf16.msra.mxu1 %v2020_v22 }
 0x556   :  { %v2028_v23 = vld [vmem:[%s2669_s10 + $0x60] sm:$0xff]  ;;  %1515 = vmatpush.bf16.msra.mxu3 %v2044_v21  ;;  %1503 = vmatpush.bf16.msra.mxu2 %v2035_v25 }
 0x557   :  { %v1092_v28 = vpop.f32.mrf.mxu3  ;;  %v1100_v30 = vrot.slane %v1099_v26, 2  ;;  %v1107_v49 = vadd.f32 %v1106_v27, %v1105_v24  ;;  %1489 = vmatpush.bf16.msra.mxu0 %v2028_v23  ;;  %v2019_v27 = vld [vmem:[%s2669_s10 + $0x18] sm:$0xff] }
 0x558   :  { %v2027_v28 = vld [vmem:[%s2669_s10 + $0x58] sm:$0xff] }
 0x559   :  { %v1101_v31 = vadd.f32 %v1100_v30, %v1099_v26  ;;  %v1108_v32 = vrot.slane %v1107_v49, 2  ;;  %v2043_v26 = vld [vmem:[%s2669_s10 + $0xd8] sm:$0xff]  ;;  %1477 = vmatpush.bf16.msra.mxu1 %v2019_v27 }
 0x55a   :  { %1516 = vmatpush.bf16.msra.mxu3 %v2043_v26 }
 0x55b   :  { %v1102_v33 = vrot.slane %v1101_v31, 1  ;;  %v1109_v34 = vadd.f32 %v1108_v32, %v1107_v49  ;;  %1490 = vmatpush.bf16.msra.mxu0 %v2027_v28 }
 0x55d   :  { %v1103_v35 = vadd.f32 %v1102_v33, %v1101_v31  ;;  %v1110_v36 = vrot.slane %v1109_v34, 1  ;;  %v2034_v33 = vld [vmem:[%s2669_s10 + $0x90] sm:$0xff] }
 0x55e   :  { %1504 = vmatpush.bf16.msra.mxu2 %v2034_v33 }
 0x55f   :  { %1113 = vrot.lane.b32.xlu2 %v1103_v35, %s2095_s4  ;;  %v1111_v37 = vadd.f32 %v1110_v36, %v1109_v34  ;;  %v2042_v34 = vld [vmem:[%s2669_s10 + $0xd0] sm:$0xff] }
 0x560   :  { %v2026_v36 = vld [vmem:[%s2669_s10 + $0x50] sm:$0xff]  ;;  %1517 = vmatpush.bf16.msra.mxu3 %v2042_v34 }
 0x561   :  { %1126 = vrot.lane.b32.xlu0 %v1111_v37, %s2095_s4  ;;  %1491 = vmatpush.bf16.msra.mxu0 %v2026_v36 }
 0x562   :  { %1505 = vmatpush.bf16.msra.mxu2 %v2033_v41 }
 0x564   :  { %1518 = vmatpush.bf16.msra.mxu3 %v2041_v42 }
 0x568   :  { %1519 = vmatpush.bf16.msra.mxu3 %v2040_v39 }
 0x5b9   :  { %v1114_v45 = vpop.permute.xlu2 %1113 }
 0x5ba   :  { %v1116_v46 = vadd.f32 %v1114_v45, %v1103_v35  ;;  %v2018_v35 = vld [vmem:[%s2669_s10 + $0x10] sm:$0xff] }
 0x5bb   :  { %1478 = vmatpush.bf16.msra.mxu1 %v2018_v35 }
 0x5bc   :  { %v1124_v48 = vmul.f32 %v1123_v47, %v1116_v46 }
 0x5be   :  { %v1131_v52 = vmul.f32 %v1124_v48, %v1124_v48 }
 0x5d3   :  { %v1127_v50 = vpop.permute.xlu0 %1126 }
 0x5d4   :  { %v1129_v51 = vadd.f32 %v1127_v50, %v1111_v37 }
 0x5d6   :  { %v1130_v53 = vmul.f32 %v1129_v51, %v1123_v47 }
 0x5d8   :  { %v1132_v54 = vsub.f32 %v1130_v53, %v1131_v52  ;;  %v2017_v52 = vld [vmem:[%s2669_s10 + $0x8] sm:$0xff] }
 0x5d9   :  { %v2025_v53 = vld [vmem:[%s2669_s10 + $0x48] sm:$0xff]  ;;  %1479 = vmatpush.bf16.msra.mxu1 %v2017_v52 }
 0x5da   :  { %v1133_v55 = vmax.f32 %v1132_v54, 0.0  ;;  %1492 = vmatpush.bf16.msra.mxu0 %v2025_v53  ;;  %v2032_v54 = vld [vmem:[%s2669_s10 + $0x80] sm:$0xff] }
 0x5db   :  { %1506 = vmatpush.bf16.msra.mxu2 %v2032_v54 }
 0x5dc   :  { %v1134_v56 = vadd.f32 1e-05, %v1133_v55  ;;  %v2016_v55 = vld [vmem:[%s2669_s10] sm:$0xff] }
 0x5dd   :  { %1480 = vmatpush.bf16.msra.mxu1 %v2016_v55  ;;  %v1525_v55 = vld [vmem:[%s2670_s11] sm:$0x1] }
 0x5de   :  { %2073 = vrsqrt.f32 %v1134_v56  ;;  %vm1141_vm0 = vweird.f32 %v1134_v56 }
 0x5df   :  { %2075 = vrcp.f32 %v2099_v12 }
 0x5e4   :  { %v2074_v57 = vpop.eup %2073 }
 0x5e5   :  { %v1136_v58 = vmul.f32 %v2074_v57, %v1134_v56  ;;  %vm1142_vm12 = vweird.f32 %v2074_v57  ;;  %v2024_v56 = vld [vmem:[%s2669_s10 + $0x40] sm:$0xff]  ;;  %v2076_v15 = vpop.eup %2075 }
 0x5e6   :  { %vm1143_vm5 = vmor %vm1141_vm0, %vm1142_vm12  ;;  %1493 = vmatpush.bf16.msra.mxu0 %v2024_v56  ;;  %v1544_v18 = vmul.f32 2.0, %v2076_v15 }
 0x5e7   :  { %v1137_v59 = vmul.f32 %v2074_v57, %v1136_v58 }
 0x5e9   :  { %v1138_v60 = vmul.f32 0.5, %v1137_v59 }
 0x5eb   :  { %v1139_v62 = vsub.f32 1.5, %v1138_v60 }
 0x5ed   :  { %v1140_v0 = vmul.f32 %v2074_v57, %v1139_v62 }
 0x5ef   :  { %v1144_v1 = vsel %vm1143_vm5, %v2074_v57, %v1140_v0 }
 0x5f0   :  { %v1145_v2 = vmul.f32 %v1144_v1, %v1094_v63 }
 0x5f2   :  { %v1149_v4 = vperm.slane %v1145_v2, 0  ;;  %v1146_v5 = vmul.f32 %v1145_v2, %v1124_v48 }
 0x5f4   :  { %1150 = vrot.lane.b32.xlu1 %v1149_v4, %s2087_s29  ;;  %v1147_v6 = vsub.f32 %v1095_v3, %v1146_v5 }
 0x5f6   :  { %v1157_v7 = vperm.slane %v1147_v6, 0 }
 0x5f8   :  { %1158 = vrot.lane.b32.xlu2 %v1157_v7, %s2087_s29 }
 0x652   :  { %v1159_v24 = vpop.permute.xlu2 %1158 }
 0x653   :  { %v1161_v49 = vsel %vm188_vm8, %v1147_v6, %v1159_v24  ;;  %v1545_v24 = vsub.f32 1.0, %v1544_v18 }
 0x654   :  { %v1162_v37 = vperm.slane %v1161_v49, 0 }
 0x666   :  { %v1151_v30 = vpop.permute.xlu1 %1150 }
 0x667   :  { %v1153_v31 = vsel %vm188_vm8, %v1145_v2, %v1151_v30  ;;  %v1546_v30 = vmul.f32 %v2076_v15, %v1545_v24 }
 0x668   :  { %v1154_v32 = vperm.slane %v1153_v31, 0 }
 0x669   :  { %v1547_v35 = vadd.f32 %v2076_v15, %v1546_v30 }
 0x66a   :  { %v1155_v38 = vmul.f32 %v1154_v32, %v2509_v20 }
 0x66c   :  { %v1163_v40 = vadd.f32 %v1162_v37, %v1155_v38 }
 0x66e   :  { %vm1164_vm7 = vcmp.ge.f32.partialorder %v1163_v40, 0.0  ;;  %v1165_v43 = vmul.f32 0.01, %v1163_v40 }
 0x670   :  { %v1166_v44 = vsel %vm1164_vm7, %v1163_v40, %v1165_v43 }
 0x671   :  { %v1167_v45 = vpack.c.bf16 %v1166_v44, %v1166_v44 }
 0x673   :  { %v1173_v20 = vsel %vm2255_vm15, %v1167_v45, 0  ;;  %v1168_v46 = vsel %vm2255_vm15, 0, %v1167_v45 }
 0x674   :  { %v1176_v47 = vsel %vm341_vm13, %v1173_v20, %v1167_v45  ;;  %v1170_v48 = vsel %vm341_vm13, %v1168_v46, 0  ;;  %vm1548_vm13 = vweird.f32 %v2076_v15 }
 0x675   :  { %v1178_v50 = vsel %vm2263_vm4, %v1176_v47, 0  ;;  %v1172_v51 = vsel %vm2263_vm4, %v1170_v48, %v1167_v45  ;;  %v1549_v41 = vsel %vm1548_vm13, %v2076_v15, %v1547_v35 }
 0x676   :  { %1187 = vrot.lane.b32.xlu1 %v1178_v50, %s2087_s29  ;;  %1180 = vrot.lane.b32.xlu0 %v1172_v51, %s2087_s29 }
 0x6e8   :  { %v1188_v57 = vpop.permute.xlu1 %1187  ;;  %v1181_v58 = vpop.permute.xlu0 %1180 }
 0x6e9   :  { %v1190_v59 = vsel %vm188_vm8, 0, %v1188_v57  ;;  %v1183_v60 = vsel %vm188_vm8, 0, %v1181_v58  ;;  %vm1527_vm8 = vcmask 517120  }
 0x6ea   :  { %v1191_v62 = vsel %vm853_vm6, %v1190_v59, 0  ;;  %v1184_v63 = vsel %vm853_vm6, %v1183_v60, 0  ;;  %v1526_v59 = vld [vmem:[%s2671_s12] sm:$0x1] }
 0x6eb   :  { %v1198_v0 = vshll.u32 %v1191_v62, 16  ;;  %v1210_v1 = vshrl.u32 %v1191_v62, 16  ;;  %v1214_v2 = vrot.slane %v1191_v62, 1  ;;  %v1193_v3 = vshll.u32 %v1184_v63, 16 }
 0x6ec   :  { %v1203_v4 = vshrl.u32 %v1184_v63, 16  ;;  %v1207_v5 = vrot.slane %v1184_v63, 1 }
 0x6ed   :  { %v1200_v6 = vrot.slane %v1198_v0, 1  ;;  %v1195_v7 = vrot.slane %v1193_v3, 1  ;;  %v1216_v8 = vsel %vm2255_vm15, %v1210_v1, %v1214_v2 }
 0x6ee   :  { %v1209_v9 = vsel %vm2255_vm15, %v1203_v4, %v1207_v5  ;;  %1520 = vmatmul.bf16.vlgmr.msra.gmra.mxu3 %v1216_v8 }
 0x6ef   :  { %1507 = vmatmul.bf16.vlgmr.msra.gmra.mxu2 %v1209_v9  ;;  %v1197_v10 = vsel %vm2255_vm15, %v1184_v63, %v1195_v7  ;;  %v1202_v11 = vsel %vm2255_vm15, %v1191_v62, %v1200_v6 }
 0x6f0   :  { %1481 = vmatmul.bf16.vlgmr.msra.gmra.mxu1 %v1197_v10  ;;  %1494 = vmatmul.bf16.vlgmr.msra.gmra.mxu0 %v1202_v11  ;;  %v2100_v10 = vmov 64.0  }
 0x76d   :  { %v1482_v13 = vpop.f32.mrf.mxu1  ;;  %v1495_v14 = vpop.f32.mrf.mxu0 }
 0x76e   :  { %v1496_v16 = vadd.f32 %v1495_v14, %v1482_v13 }
 0x771   :  { %v1521_v17 = vpop.f32.mrf.mxu3 }
 0x772   :  { %v1508_v19 = vpop.f32.mrf.mxu2 }
 0x773   :  { %v1509_v61 = vadd.f32 %v1508_v19, %v1496_v16 }
 0x775   :  { %v1522_v21 = vadd.f32 %v1521_v17, %v1509_v61  ;;  %v1484_v22 = vpop.f32.mrf.mxu1  ;;  %v1497_v23 = vpop.f32.mrf.mxu0 }
 0x777   :  { %v1535_v25 = vmul.f32 %v1522_v21, %v1522_v21  ;;  %v1528_v29 = vsel %vm1527_vm8, %v1522_v21, 0.0 }
 0x778   :  { %v1529_v26 = vrot.slane %v1528_v29, 4 }
 0x779   :  { %v1523_v27 = vpop.f32.mrf.mxu3  ;;  %v1536_v28 = vsel %vm1527_vm8, %v1535_v25, 0.0 }
 0x77a   :  { %v1510_v49 = vpop.f32.mrf.mxu2  ;;  %v1530_v31 = vadd.f32 %v1529_v26, %v1528_v29  ;;  %v1537_v32 = vrot.slane %v1536_v28, 4 }
 0x77c   :  { %v1531_v33 = vrot.slane %v1530_v31, 2  ;;  %v1538_v34 = vadd.f32 %v1537_v32, %v1536_v28 }
 0x77e   :  { %v1532_v36 = vadd.f32 %v1531_v33, %v1530_v31  ;;  %v1539_v37 = vrot.slane %v1538_v34, 2 }
 0x780   :  { %v1533_v38 = vrot.slane %v1532_v36, 1  ;;  %v1540_v40 = vadd.f32 %v1539_v37, %v1538_v34 }
 0x782   :  { %v1534_v42 = vadd.f32 %v1533_v38, %v1532_v36  ;;  %v1541_v43 = vrot.slane %v1540_v40, 1 }
 0x784   :  { %v1542_v44 = vadd.f32 %v1541_v43, %v1540_v40  ;;  %v1550_v45 = vmul.f32 %v1549_v41, %v1534_v42 }
 0x786   :  { %v1551_v20 = vmul.f32 %v1549_v41, %v1542_v44  ;;  %v1552_v46 = vmul.f32 %v1550_v45, %v1550_v45 }
 0x788   :  { %v1553_v47 = vsub.f32 %v1551_v20, %v1552_v46 }
 0x78a   :  { %v1554_v48 = vmax.f32 %v1553_v47, 0.0 }
 0x78c   :  { %v1555_v50 = vadd.f32 1e-05, %v1554_v48 }
 0x78e   :  { %2077 = vrsqrt.f32 %v1555_v50  ;;  %vm1562_vm4 = vweird.f32 %v1555_v50 }
 0x794   :  { %v2078_v51 = vpop.eup %2077 }
 0x795   :  { %v1557_v52 = vmul.f32 %v2078_v51, %v1555_v50  ;;  %vm1563_vm15 = vweird.f32 %v2078_v51 }
 0x796   :  { %vm1564_vm14 = vmor %vm1562_vm4, %vm1563_vm15 }
 0x797   :  { %v1558_v53 = vmul.f32 %v2078_v51, %v1557_v52 }
 0x799   :  { %v1559_v54 = vmul.f32 0.5, %v1558_v53 }
 0x79b   :  { %v1560_v39 = vsub.f32 1.5, %v1559_v54 }
 0x79d   :  { %v1561_v56 = vmul.f32 %v2078_v51, %v1560_v39 }
 0x79f   :  { %v1565_v57 = vsel %vm1564_vm14, %v2078_v51, %v1561_v56 }
 0x7a0   :  { %v1566_v58 = vmul.f32 %v1565_v57, %v1525_v55 }
 0x7a2   :  { %v1567_v60 = vmul.f32 %v1566_v58, %v1550_v45  ;;  %v1570_v62 = vperm.slane %v1566_v58, 0 }
 0x7a4   :  { %v1568_v63 = vsub.f32 %v1526_v59, %v1567_v60  ;;  %v1572_v0 = vmul.f32 %v1570_v62, %v1522_v21 }
 0x7a6   :  { %v1574_v1 = vperm.slane %v1568_v63, 0 }
 0x7a8   :  { %v1576_v2 = vadd.f32 %v1574_v1, %v1572_v0 }
 0x7aa   :  { %vm1577_vm1 = vcmp.ge.f32.partialorder %v1576_v2, 0.0  ;;  %v1578_v3 = vmul.f32 0.01, %v1576_v2 }
 0x7ac   :  { %v1579_v4 = vsel %vm1577_vm1, %v1576_v2, %v1578_v3 }
 0x7ad   :  { %v1580_v5 = vmul.f32 0.5, %v1579_v4 }
 0x7af   :  { %2079 = vtanh.f32 %v1580_v5 }
 0x7b0   :  { %2081 = vrcp.f32 %v2100_v10 }
 0x7b5   :  { %v2080_v6 = vpop.eup %2079 }
 0x7b6   :  { %v1582_v7 = vadd.f32 1.0, %v2080_v6  ;;  %v2082_v11 = vpop.eup %2081 }
 0x7b7   :  { %v1588_v12 = vmul.f32 64.0, %v2082_v11  ;;  %vm1592_vm3 = vweird.f32 %v2082_v11 }
 0x7b8   :  { %v1583_v8 = vmul.f32 0.5, %v1582_v7 }
 0x7b9   :  { %v1589_v13 = vsub.f32 1.0, %v1588_v12 }
 0x7ba   :  { %v1584_v9 = vsel %vm1527_vm8, %v1583_v8, 0.0 }
 0x7bb   :  { %1585 = vadd.xlane.f32.xlu2 %v1584_v9  ;;  %v1590_v14 = vmul.f32 %v2082_v11, %v1589_v13 }
 0x7bd   :  { %v1591_v15 = vadd.f32 %v2082_v11, %v1590_v14 }
 0x7bf   :  { %v1593_v16 = vsel %vm1592_vm3, %v2082_v11, %v1591_v15 }
 0x82e   :  { %v1586_v17 = vpop.xlane.xlu2 %1585 }
 0x82f   :  { %v1594_v18 = vmul.f32 %v1593_v16, %v1586_v17 }
 0x831   :  { %1596 = vst.msk [vmem:[%s2672_s13] sm:$0x3] %vm1595_vm9, %v1594_v18 }

</bundles_post_ra>
